<compile_context>
chip_gen: v7x
topology: tpu7x:2x2x1
jax: 0.10.0
libtpu: 0.0.40
codegen_flags: <defaults>
</compile_context>

<pallas_src>
import jax
import jax.numpy as jnp
from jax.experimental import pallas as pl
from jax.experimental.pallas import tpu as pltpu


# -----------------------------------------------------------------------------
# Fused kernel: num_layers LSTM layers + final projection, single invocation.
# -----------------------------------------------------------------------------
def make_fused_lstm_kernel(T, B, H, num_layers):
    def kernel(*refs):
        # ---- unpack (in_refs..., out_ref, scratch_refs...) -------------------
        x_ref = refs[0]                              # (T*B, D0)
        pos = 1
        layers = []
        for _ in range(num_layers):
            layers.append((refs[pos], refs[pos + 1], refs[pos + 2]))
            pos += 3
        wp_ref, bp_ref = refs[pos], refs[pos + 1]    # (H, F), (1, F)
        out_ref = refs[pos + 2]                      # (T*B, F)
        seq_sc = (refs[pos + 3], refs[pos + 4])      # ping-pong (T*B, H) scratch

        # ---- LSTM layers ------------------------------------------------------
        cur = x_ref[...]                             # (T*B, D_in) f32
        for l, (wih_ref, whh_ref, b_ref) in enumerate(layers):
            # Hoist weight/bias loads out of the serial time loop.
            wih = wih_ref[...]                       # (D_in, 4H)  gate order i,f,g,o
            whh = whh_ref[...]                       # (H, 4H)
            bias = b_ref[...]                        # (1, 4H)

            # Input contribution for ALL timesteps in one MXU pass
            # (off the recurrence critical path).
            pre = jnp.dot(cur, wih, preferred_element_type=jnp.float32) + bias

            dst = seq_sc[l % 2]
            h = jnp.zeros((B, H), jnp.float32)
            c = jnp.zeros((B, H), jnp.float32)
            for t in range(T):                       # static unroll, T small
                gates = (pre[t * B:(t + 1) * B, :]
                         + jnp.dot(h, whh, preferred_element_type=jnp.float32))
                i_g = jax.nn.sigmoid(gates[:, 0 * H:1 * H])
                f_g = jax.nn.sigmoid(gates[:, 1 * H:2 * H])
                g_g = jnp.tanh(gates[:, 2 * H:3 * H])
                o_g = jax.nn.sigmoid(gates[:, 3 * H:4 * H])
                c = f_g * c + i_g * g_g
                h = o_g * jnp.tanh(c)
                dst[t * B:(t + 1) * B, :] = h        # static-offset VMEM store
            cur = dst[...]                           # (T*B, H) dense slab

        # ---- projection: one matmul over the whole sequence, one store -------
        out_ref[...] = (
            jnp.dot(cur, wp_ref[...], preferred_element_type=jnp.float32)
            + bp_ref[...]
        ).astype(out_ref.dtype)

    return kernel


# -----------------------------------------------------------------------------
# Wrapper
# -----------------------------------------------------------------------------
def recurrent_module_forward(x_btd, params):
    """x_btd: (B, T, input_size) batch-first, matching the PyTorch forward."""
    B, T, D = x_btd.shape
    H = params["layers"][0][1].shape[0]              # w_hh_t is (H, 4H)
    F = params["w_p_t"].shape[1]
    L = len(params["layers"])

    # Time-major and flattened: every full-sequence matmul sees T*B rows
    # (much better sublane / MXU-row occupancy than B rows).
    x_flat = jnp.transpose(x_btd, (1, 0, 2)).reshape(T * B, D).astype(jnp.float32)

    args = [x_flat]
    for (w_ih_t, w_hh_t, bias) in params["layers"]:
        args += [w_ih_t, w_hh_t, bias]
    args += [params["w_p_t"], params["b_p"]]

    out_flat = pl.pallas_call(
        make_fused_lstm_kernel(T, B, H, L),
        out_shape=jax.ShapeDtypeStruct((T * B, F), jnp.float32),
        # No grid: single invocation, whole arrays resident in VMEM (default
        # full-array BlockSpecs). Total footprint here is ~30 KiB.
        scratch_shapes=[
            pltpu.VMEM((T * B, H), jnp.float32),
            pltpu.VMEM((T * B, H), jnp.float32),
        ],
    )(*args)

    return jnp.transpose(out_flat.reshape(T, B, F), (1, 0, 2))   # (B, T, F)


# -----------------------------------------------------------------------------
# Deterministic parameter init (PyTorch default: U(-1/sqrt(H), 1/sqrt(H)))
# -----------------------------------------------------------------------------
def init_params(key, input_size, hidden_size, num_layers, num_factors):
    bound = 1.0 / jnp.sqrt(hidden_size)
    params = {"layers": []}
    for layer in range(num_layers):
        d_in = input_size if layer == 0 else hidden_size
        key, k1, k2, k3, k4 = jax.random.split(key, 5)
        # PyTorch layout: weight_ih (4H, d_in); stored transposed (d_in, 4H).
        w_ih = jax.random.uniform(k1, (4 * hidden_size, d_in),
                                  minval=-bound, maxval=bound, dtype=jnp.float32)
        w_hh = jax.random.uniform(k2, (4 * hidden_size, hidden_size),
                                  minval=-bound, maxval=bound, dtype=jnp.float32)
        b_ih = jax.random.uniform(k3, (4 * hidden_size,),
                                  minval=-bound, maxval=bound, dtype=jnp.float32)
        b_hh = jax.random.uniform(k4, (4 * hidden_size,),
                                  minval=-bound, maxval=bound, dtype=jnp.float32)
        params["layers"].append(
            (w_ih.T, w_hh.T, (b_ih + b_hh).reshape(1, 4 * hidden_size))
        )
    key, k5, k6 = jax.random.split(key, 3)
    pbound = 1.0 / jnp.sqrt(hidden_size)
    w_p = jax.random.uniform(k5, (num_factors, hidden_size),
                             minval=-pbound, maxval=pbound, dtype=jnp.float32)
    b_p = jax.random.uniform(k6, (num_factors,),
                             minval=-pbound, maxval=pbound, dtype=jnp.float32)
    params["w_p_t"] = w_p.T
    params["b_p"] = b_p.reshape(1, num_factors)
    return params


# -----------------------------------------------------------------------------
# Pure-JAX reference (numerical sanity check)
# -----------------------------------------------------------------------------
def reference_forward(x_btd, params, hidden_size):
    h_seq = jnp.transpose(x_btd, (1, 0, 2)).astype(jnp.float32)  # (T, B, D)
    B = h_seq.shape[1]
    for (w_ih_t, w_hh_t, bias) in params["layers"]:
        def step(carry, x_t):
            h, c = carry
            gates = x_t @ w_ih_t + h @ w_hh_t + bias
            i = jax.nn.sigmoid(gates[:, 0 * hidden_size:1 * hidden_size])
            f = jax.nn.sigmoid(gates[:, 1 * hidden_size:2 * hidden_size])
            g = jnp.tanh(gates[:, 2 * hidden_size:3 * hidden_size])
            o = jax.nn.sigmoid(gates[:, 3 * hidden_size:4 * hidden_size])
            c = f * c + i * g
            h = o * jnp.tanh(c)
            return (h, c), h
        init = (jnp.zeros((B, hidden_size), jnp.float32),
                jnp.zeros((B, hidden_size), jnp.float32))
        _, h_seq = jax.lax.scan(step, init, h_seq)
    out = h_seq @ params["w_p_t"] + params["b_p"]
    return jnp.transpose(out, (1, 0, 2))


# -----------------------------------------------------------------------------
if __name__ == "__main__":
    # Module config: RecurrentModule('LSTM', input_size=16, hidden_size=32,
    #                                num_layers=2, num_factors=4)
    B, T = 2, 8
    INPUT_SIZE, HIDDEN_SIZE, NUM_LAYERS, NUM_FACTORS = 16, 32, 2, 4

    key = jax.random.PRNGKey(0)
    key, kx = jax.random.split(key)
    x = jax.random.normal(kx, (B, T, INPUT_SIZE), dtype=jnp.float32)

    params = init_params(key, INPUT_SIZE, HIDDEN_SIZE, NUM_LAYERS, NUM_FACTORS)

    fwd = jax.jit(recurrent_module_forward)
    out = jax.block_until_ready(fwd(x, params))

    ref = reference_forward(x, params, HIDDEN_SIZE)
    assert out.shape == (B, T, NUM_FACTORS), out.shape
    assert jnp.allclose(out, ref, atol=1e-4, rtol=1e-4), \
        float(jnp.max(jnp.abs(out - ref)))

    print("KERNEL_OK")
</pallas_src>

<mosaic_0001>
module attributes {stable_mosaic.version = 11 : i64} {
  func.func @kernel(%arg0: memref<16x16xf32, #tpu.memory_space<vmem>>, %arg1: memref<16x128xf32, #tpu.memory_space<vmem>>, %arg2: memref<32x128xf32, #tpu.memory_space<vmem>>, %arg3: memref<1x128xf32, #tpu.memory_space<vmem>>, %arg4: memref<32x128xf32, #tpu.memory_space<vmem>>, %arg5: memref<32x128xf32, #tpu.memory_space<vmem>>, %arg6: memref<1x128xf32, #tpu.memory_space<vmem>>, %arg7: memref<32x4xf32, #tpu.memory_space<vmem>>, %arg8: memref<1x4xf32, #tpu.memory_space<vmem>>, %arg9: memref<16x4xf32, #tpu.memory_space<vmem>>, %arg10: memref<16x32xf32, #tpu.memory_space<vmem>>, %arg11: memref<16x32xf32, #tpu.memory_space<vmem>>) attributes {dimension_semantics = [], scalar_prefetch = 0 : i64, scratch_operands = 2 : i64, tpu.core_type = #tpu.core_type<tc>} {
    %c0 = arith.constant 0 : index
    %c0_0 = arith.constant 0 : index
    %0 = vector.load %arg0[%c0, %c0_0] : memref<16x16xf32, #tpu.memory_space<vmem>>, vector<16x16xf32>
    %c0_1 = arith.constant 0 : index
    %c0_2 = arith.constant 0 : index
    %1 = vector.load %arg1[%c0_1, %c0_2] : memref<16x128xf32, #tpu.memory_space<vmem>>, vector<16x128xf32>
    %c0_3 = arith.constant 0 : index
    %c0_4 = arith.constant 0 : index
    %2 = vector.load %arg2[%c0_3, %c0_4] : memref<32x128xf32, #tpu.memory_space<vmem>>, vector<32x128xf32>
    %c0_5 = arith.constant 0 : index
    %c0_6 = arith.constant 0 : index
    %3 = vector.load %arg3[%c0_5, %c0_6] : memref<1x128xf32, #tpu.memory_space<vmem>>, vector<1x128xf32>
    %cst = arith.constant dense<0.000000e+00> : vector<16x128xf32>
    %4 = tpu.matmul %0, %1, %cst {dimension_numbers = #tpu.dot_dimension_numbers<[1], [0], [0], [1], [0, 0, 1, 1], [], []>} : vector<16x16xf32>, vector<16x128xf32>, vector<16x128xf32> -> vector<16x128xf32>
    %5 = vector.broadcast %3 : vector<1x128xf32> to vector<16x128xf32>
    %6 = arith.addf %4, %5 : vector<16x128xf32>
    %cst_7 = arith.constant 0.000000e+00 : f32
    %7 = vector.broadcast %cst_7 : f32 to vector<2x32xf32>
    %cst_8 = arith.constant 0.000000e+00 : f32
    %8 = vector.broadcast %cst_8 : f32 to vector<2x32xf32>
    %9 = vector.extract_strided_slice %6 {offsets = [0, 0], sizes = [2, 128], strides = [1, 1]} : vector<16x128xf32> to vector<2x128xf32>
    %cst_9 = arith.constant dense<0.000000e+00> : vector<2x128xf32>
    %10 = tpu.matmul %7, %2, %cst_9 {dimension_numbers = #tpu.dot_dimension_numbers<[1], [0], [0], [1], [0, 0, 1, 1], [], []>} : vector<2x32xf32>, vector<32x128xf32>, vector<2x128xf32> -> vector<2x128xf32>
    %11 = arith.addf %9, %10 : vector<2x128xf32>
    %12 = vector.extract_strided_slice %11 {offsets = [0, 0], sizes = [2, 32], strides = [1, 1]} : vector<2x128xf32> to vector<2x32xf32>
    %13 = arith.negf %12 : vector<2x32xf32>
    %14 = math.exp %13 : vector<2x32xf32>
    %cst_10 = arith.constant 1.000000e+00 : f32
    %15 = vector.broadcast %cst_10 : f32 to vector<2x32xf32>
    %16 = arith.addf %15, %14 : vector<2x32xf32>
    %17 = arith.divf %15, %16 : vector<2x32xf32>
    %18 = vector.extract_strided_slice %11 {offsets = [0, 32], sizes = [2, 32], strides = [1, 1]} : vector<2x128xf32> to vector<2x32xf32>
    %19 = arith.negf %18 : vector<2x32xf32>
    %20 = math.exp %19 : vector<2x32xf32>
    %cst_11 = arith.constant 1.000000e+00 : f32
    %21 = vector.broadcast %cst_11 : f32 to vector<2x32xf32>
    %22 = arith.addf %21, %20 : vector<2x32xf32>
    %23 = arith.divf %21, %22 : vector<2x32xf32>
    %24 = vector.extract_strided_slice %11 {offsets = [0, 64], sizes = [2, 32], strides = [1, 1]} : vector<2x128xf32> to vector<2x32xf32>
    %25 = math.tanh %24 : vector<2x32xf32>
    %26 = vector.extract_strided_slice %11 {offsets = [0, 96], sizes = [2, 32], strides = [1, 1]} : vector<2x128xf32> to vector<2x32xf32>
    %27 = arith.negf %26 : vector<2x32xf32>
    %28 = math.exp %27 : vector<2x32xf32>
    %cst_12 = arith.constant 1.000000e+00 : f32
    %29 = vector.broadcast %cst_12 : f32 to vector<2x32xf32>
    %30 = arith.addf %29, %28 : vector<2x32xf32>
    %31 = arith.divf %29, %30 : vector<2x32xf32>
    %32 = arith.mulf %23, %8 : vector<2x32xf32>
    %33 = arith.mulf %17, %25 : vector<2x32xf32>
    %34 = arith.addf %32, %33 : vector<2x32xf32>
    %35 = math.tanh %34 : vector<2x32xf32>
    %36 = arith.mulf %31, %35 : vector<2x32xf32>
    %c0_13 = arith.constant 0 : index
    %c0_14 = arith.constant 0 : index
    %37 = vector.load %arg10[%c0_13, %c0_14] : memref<16x32xf32, #tpu.memory_space<vmem>>, vector<2x32xf32>
    tpu.vector_store %arg10[%c0_13, %c0_14], %36 {strides = array<i32>} : memref<16x32xf32, #tpu.memory_space<vmem>>, vector<2x32xf32>,
    %38 = vector.extract_strided_slice %6 {offsets = [2, 0], sizes = [2, 128], strides = [1, 1]} : vector<16x128xf32> to vector<2x128xf32>
    %cst_15 = arith.constant dense<0.000000e+00> : vector<2x128xf32>
    %39 = tpu.matmul %36, %2, %cst_15 {dimension_numbers = #tpu.dot_dimension_numbers<[1], [0], [0], [1], [0, 0, 1, 1], [], []>} : vector<2x32xf32>, vector<32x128xf32>, vector<2x128xf32> -> vector<2x128xf32>
    %40 = arith.addf %38, %39 : vector<2x128xf32>
    %41 = vector.extract_strided_slice %40 {offsets = [0, 0], sizes = [2, 32], strides = [1, 1]} : vector<2x128xf32> to vector<2x32xf32>
    %42 = arith.negf %41 : vector<2x32xf32>
    %43 = math.exp %42 : vector<2x32xf32>
    %cst_16 = arith.constant 1.000000e+00 : f32
    %44 = vector.broadcast %cst_16 : f32 to vector<2x32xf32>
    %45 = arith.addf %44, %43 : vector<2x32xf32>
    %46 = arith.divf %44, %45 : vector<2x32xf32>
    %47 = vector.extract_strided_slice %40 {offsets = [0, 32], sizes = [2, 32], strides = [1, 1]} : vector<2x128xf32> to vector<2x32xf32>
    %48 = arith.negf %47 : vector<2x32xf32>
    %49 = math.exp %48 : vector<2x32xf32>
    %cst_17 = arith.constant 1.000000e+00 : f32
    %50 = vector.broadcast %cst_17 : f32 to vector<2x32xf32>
    %51 = arith.addf %50, %49 : vector<2x32xf32>
    %52 = arith.divf %50, %51 : vector<2x32xf32>
    %53 = vector.extract_strided_slice %40 {offsets = [0, 64], sizes = [2, 32], strides = [1, 1]} : vector<2x128xf32> to vector<2x32xf32>
    %54 = math.tanh %53 : vector<2x32xf32>
    %55 = vector.extract_strided_slice %40 {offsets = [0, 96], sizes = [2, 32], strides = [1, 1]} : vector<2x128xf32> to vector<2x32xf32>
    %56 = arith.negf %55 : vector<2x32xf32>
    %57 = math.exp %56 : vector<2x32xf32>
    %cst_18 = arith.constant 1.000000e+00 : f32
    %58 = vector.broadcast %cst_18 : f32 to vector<2x32xf32>
    %59 = arith.addf %58, %57 : vector<2x32xf32>
    %60 = arith.divf %58, %59 : vector<2x32xf32>
    %61 = arith.mulf %52, %34 : vector<2x32xf32>
    %62 = arith.mulf %46, %54 : vector<2x32xf32>
    %63 = arith.addf %61, %62 : vector<2x32xf32>
    %64 = math.tanh %63 : vector<2x32xf32>
    %65 = arith.mulf %60, %64 : vector<2x32xf32>
    %c2 = arith.constant 2 : index
    %c0_19 = arith.constant 0 : index
    %66 = vector.load %arg10[%c2, %c0_19] : memref<16x32xf32, #tpu.memory_space<vmem>>, vector<2x32xf32>
    tpu.vector_store %arg10[%c2, %c0_19], %65 {strides = array<i32>} : memref<16x32xf32, #tpu.memory_space<vmem>>, vector<2x32xf32>,
    %67 = vector.extract_strided_slice %6 {offsets = [4, 0], sizes = [2, 128], strides = [1, 1]} : vector<16x128xf32> to vector<2x128xf32>
    %cst_20 = arith.constant dense<0.000000e+00> : vector<2x128xf32>
    %68 = tpu.matmul %65, %2, %cst_20 {dimension_numbers = #tpu.dot_dimension_numbers<[1], [0], [0], [1], [0, 0, 1, 1], [], []>} : vector<2x32xf32>, vector<32x128xf32>, vector<2x128xf32> -> vector<2x128xf32>
    %69 = arith.addf %67, %68 : vector<2x128xf32>
    %70 = vector.extract_strided_slice %69 {offsets = [0, 0], sizes = [2, 32], strides = [1, 1]} : vector<2x128xf32> to vector<2x32xf32>
    %71 = arith.negf %70 : vector<2x32xf32>
    %72 = math.exp %71 : vector<2x32xf32>
    %cst_21 = arith.constant 1.000000e+00 : f32
    %73 = vector.broadcast %cst_21 : f32 to vector<2x32xf32>
    %74 = arith.addf %73, %72 : vector<2x32xf32>
    %75 = arith.divf %73, %74 : vector<2x32xf32>
    %76 = vector.extract_strided_slice %69 {offsets = [0, 32], sizes = [2, 32], strides = [1, 1]} : vector<2x128xf32> to vector<2x32xf32>
    %77 = arith.negf %76 : vector<2x32xf32>
    %78 = math.exp %77 : vector<2x32xf32>
    %cst_22 = arith.constant 1.000000e+00 : f32
    %79 = vector.broadcast %cst_22 : f32 to vector<2x32xf32>
    %80 = arith.addf %79, %78 : vector<2x32xf32>
    %81 = arith.divf %79, %80 : vector<2x32xf32>
    %82 = vector.extract_strided_slice %69 {offsets = [0, 64], sizes = [2, 32], strides = [1, 1]} : vector<2x128xf32> to vector<2x32xf32>
    %83 = math.tanh %82 : vector<2x32xf32>
    %84 = vector.extract_strided_slice %69 {offsets = [0, 96], sizes = [2, 32], strides = [1, 1]} : vector<2x128xf32> to vector<2x32xf32>
    %85 = arith.negf %84 : vector<2x32xf32>
    %86 = math.exp %85 : vector<2x32xf32>
    %cst_23 = arith.constant 1.000000e+00 : f32
    %87 = vector.broadcast %cst_23 : f32 to vector<2x32xf32>
    %88 = arith.addf %87, %86 : vector<2x32xf32>
    %89 = arith.divf %87, %88 : vector<2x32xf32>
    %90 = arith.mulf %81, %63 : vector<2x32xf32>
    %91 = arith.mulf %75, %83 : vector<2x32xf32>
    %92 = arith.addf %90, %91 : vector<2x32xf32>
    %93 = math.tanh %92 : vector<2x32xf32>
    %94 = arith.mulf %89, %93 : vector<2x32xf32>
    %c4 = arith.constant 4 : index
    %c0_24 = arith.constant 0 : index
    %95 = vector.load %arg10[%c4, %c0_24] : memref<16x32xf32, #tpu.memory_space<vmem>>, vector<2x32xf32>
    tpu.vector_store %arg10[%c4, %c0_24], %94 {strides = array<i32>} : memref<16x32xf32, #tpu.memory_space<vmem>>, vector<2x32xf32>,
    %96 = vector.extract_strided_slice %6 {offsets = [6, 0], sizes = [2, 128], strides = [1, 1]} : vector<16x128xf32> to vector<2x128xf32>
    %cst_25 = arith.constant dense<0.000000e+00> : vector<2x128xf32>
    %97 = tpu.matmul %94, %2, %cst_25 {dimension_numbers = #tpu.dot_dimension_numbers<[1], [0], [0], [1], [0, 0, 1, 1], [], []>} : vector<2x32xf32>, vector<32x128xf32>, vector<2x128xf32> -> vector<2x128xf32>
    %98 = arith.addf %96, %97 : vector<2x128xf32>
    %99 = vector.extract_strided_slice %98 {offsets = [0, 0], sizes = [2, 32], strides = [1, 1]} : vector<2x128xf32> to vector<2x32xf32>
    %100 = arith.negf %99 : vector<2x32xf32>
    %101 = math.exp %100 : vector<2x32xf32>
    %cst_26 = arith.constant 1.000000e+00 : f32
    %102 = vector.broadcast %cst_26 : f32 to vector<2x32xf32>
    %103 = arith.addf %102, %101 : vector<2x32xf32>
    %104 = arith.divf %102, %103 : vector<2x32xf32>
    %105 = vector.extract_strided_slice %98 {offsets = [0, 32], sizes = [2, 32], strides = [1, 1]} : vector<2x128xf32> to vector<2x32xf32>
    %106 = arith.negf %105 : vector<2x32xf32>
    %107 = math.exp %106 : vector<2x32xf32>
    %cst_27 = arith.constant 1.000000e+00 : f32
    %108 = vector.broadcast %cst_27 : f32 to vector<2x32xf32>
    %109 = arith.addf %108, %107 : vector<2x32xf32>
    %110 = arith.divf %108, %109 : vector<2x32xf32>
    %111 = vector.extract_strided_slice %98 {offsets = [0, 64], sizes = [2, 32], strides = [1, 1]} : vector<2x128xf32> to vector<2x32xf32>
    %112 = math.tanh %111 : vector<2x32xf32>
    %113 = vector.extract_strided_slice %98 {offsets = [0, 96], sizes = [2, 32], strides = [1, 1]} : vector<2x128xf32> to vector<2x32xf32>
    %114 = arith.negf %113 : vector<2x32xf32>
    %115 = math.exp %114 : vector<2x32xf32>
    %cst_28 = arith.constant 1.000000e+00 : f32
    %116 = vector.broadcast %cst_28 : f32 to vector<2x32xf32>
    %117 = arith.addf %116, %115 : vector<2x32xf32>
    %118 = arith.divf %116, %117 : vector<2x32xf32>
    %119 = arith.mulf %110, %92 : vector<2x32xf32>
    %120 = arith.mulf %104, %112 : vector<2x32xf32>
    %121 = arith.addf %119, %120 : vector<2x32xf32>
    %122 = math.tanh %121 : vector<2x32xf32>
    %123 = arith.mulf %118, %122 : vector<2x32xf32>
    %c6 = arith.constant 6 : index
    %c0_29 = arith.constant 0 : index
    %124 = vector.load %arg10[%c6, %c0_29] : memref<16x32xf32, #tpu.memory_space<vmem>>, vector<2x32xf32>
    tpu.vector_store %arg10[%c6, %c0_29], %123 {strides = array<i32>} : memref<16x32xf32, #tpu.memory_space<vmem>>, vector<2x32xf32>,
    %125 = vector.extract_strided_slice %6 {offsets = [8, 0], sizes = [2, 128], strides = [1, 1]} : vector<16x128xf32> to vector<2x128xf32>
    %cst_30 = arith.constant dense<0.000000e+00> : vector<2x128xf32>
    %126 = tpu.matmul %123, %2, %cst_30 {dimension_numbers = #tpu.dot_dimension_numbers<[1], [0], [0], [1], [0, 0, 1, 1], [], []>} : vector<2x32xf32>, vector<32x128xf32>, vector<2x128xf32> -> vector<2x128xf32>
    %127 = arith.addf %125, %126 : vector<2x128xf32>
    %128 = vector.extract_strided_slice %127 {offsets = [0, 0], sizes = [2, 32], strides = [1, 1]} : vector<2x128xf32> to vector<2x32xf32>
    %129 = arith.negf %128 : vector<2x32xf32>
    %130 = math.exp %129 : vector<2x32xf32>
    %cst_31 = arith.constant 1.000000e+00 : f32
    %131 = vector.broadcast %cst_31 : f32 to vector<2x32xf32>
    %132 = arith.addf %131, %130 : vector<2x32xf32>
    %133 = arith.divf %131, %132 : vector<2x32xf32>
    %134 = vector.extract_strided_slice %127 {offsets = [0, 32], sizes = [2, 32], strides = [1, 1]} : vector<2x128xf32> to vector<2x32xf32>
    %135 = arith.negf %134 : vector<2x32xf32>
    %136 = math.exp %135 : vector<2x32xf32>
    %cst_32 = arith.constant 1.000000e+00 : f32
    %137 = vector.broadcast %cst_32 : f32 to vector<2x32xf32>
    %138 = arith.addf %137, %136 : vector<2x32xf32>
    %139 = arith.divf %137, %138 : vector<2x32xf32>
    %140 = vector.extract_strided_slice %127 {offsets = [0, 64], sizes = [2, 32], strides = [1, 1]} : vector<2x128xf32> to vector<2x32xf32>
    %141 = math.tanh %140 : vector<2x32xf32>
    %142 = vector.extract_strided_slice %127 {offsets = [0, 96], sizes = [2, 32], strides = [1, 1]} : vector<2x128xf32> to vector<2x32xf32>
    %143 = arith.negf %142 : vector<2x32xf32>
    %144 = math.exp %143 : vector<2x32xf32>
    %cst_33 = arith.constant 1.000000e+00 : f32
    %145 = vector.broadcast %cst_33 : f32 to vector<2x32xf32>
    %146 = arith.addf %145, %144 : vector<2x32xf32>
    %147 = arith.divf %145, %146 : vector<2x32xf32>
    %148 = arith.mulf %139, %121 : vector<2x32xf32>
    %149 = arith.mulf %133, %141 : vector<2x32xf32>
    %150 = arith.addf %148, %149 : vector<2x32xf32>
    %151 = math.tanh %150 : vector<2x32xf32>
    %152 = arith.mulf %147, %151 : vector<2x32xf32>
    %c8 = arith.constant 8 : index
    %c0_34 = arith.constant 0 : index
    %153 = vector.load %arg10[%c8, %c0_34] : memref<16x32xf32, #tpu.memory_space<vmem>>, vector<2x32xf32>
    tpu.vector_store %arg10[%c8, %c0_34], %152 {strides = array<i32>} : memref<16x32xf32, #tpu.memory_space<vmem>>, vector<2x32xf32>,
    %154 = vector.extract_strided_slice %6 {offsets = [10, 0], sizes = [2, 128], strides = [1, 1]} : vector<16x128xf32> to vector<2x128xf32>
    %cst_35 = arith.constant dense<0.000000e+00> : vector<2x128xf32>
    %155 = tpu.matmul %152, %2, %cst_35 {dimension_numbers = #tpu.dot_dimension_numbers<[1], [0], [0], [1], [0, 0, 1, 1], [], []>} : vector<2x32xf32>, vector<32x128xf32>, vector<2x128xf32> -> vector<2x128xf32>
    %156 = arith.addf %154, %155 : vector<2x128xf32>
    %157 = vector.extract_strided_slice %156 {offsets = [0, 0], sizes = [2, 32], strides = [1, 1]} : vector<2x128xf32> to vector<2x32xf32>
    %158 = arith.negf %157 : vector<2x32xf32>
    %159 = math.exp %158 : vector<2x32xf32>
    %cst_36 = arith.constant 1.000000e+00 : f32
    %160 = vector.broadcast %cst_36 : f32 to vector<2x32xf32>
    %161 = arith.addf %160, %159 : vector<2x32xf32>
    %162 = arith.divf %160, %161 : vector<2x32xf32>
    %163 = vector.extract_strided_slice %156 {offsets = [0, 32], sizes = [2, 32], strides = [1, 1]} : vector<2x128xf32> to vector<2x32xf32>
    %164 = arith.negf %163 : vector<2x32xf32>
    %165 = math.exp %164 : vector<2x32xf32>
    %cst_37 = arith.constant 1.000000e+00 : f32
    %166 = vector.broadcast %cst_37 : f32 to vector<2x32xf32>
    %167 = arith.addf %166, %165 : vector<2x32xf32>
    %168 = arith.divf %166, %167 : vector<2x32xf32>
    %169 = vector.extract_strided_slice %156 {offsets = [0, 64], sizes = [2, 32], strides = [1, 1]} : vector<2x128xf32> to vector<2x32xf32>
    %170 = math.tanh %169 : vector<2x32xf32>
    %171 = vector.extract_strided_slice %156 {offsets = [0, 96], sizes = [2, 32], strides = [1, 1]} : vector<2x128xf32> to vector<2x32xf32>
    %172 = arith.negf %171 : vector<2x32xf32>
    %173 = math.exp %172 : vector<2x32xf32>
    %cst_38 = arith.constant 1.000000e+00 : f32
    %174 = vector.broadcast %cst_38 : f32 to vector<2x32xf32>
    %175 = arith.addf %174, %173 : vector<2x32xf32>
    %176 = arith.divf %174, %175 : vector<2x32xf32>
    %177 = arith.mulf %168, %150 : vector<2x32xf32>
    %178 = arith.mulf %162, %170 : vector<2x32xf32>
    %179 = arith.addf %177, %178 : vector<2x32xf32>
    %180 = math.tanh %179 : vector<2x32xf32>
    %181 = arith.mulf %176, %180 : vector<2x32xf32>
    %c10 = arith.constant 10 : index
    %c0_39 = arith.constant 0 : index
    %182 = vector.load %arg10[%c10, %c0_39] : memref<16x32xf32, #tpu.memory_space<vmem>>, vector<2x32xf32>
    tpu.vector_store %arg10[%c10, %c0_39], %181 {strides = array<i32>} : memref<16x32xf32, #tpu.memory_space<vmem>>, vector<2x32xf32>,
    %183 = vector.extract_strided_slice %6 {offsets = [12, 0], sizes = [2, 128], strides = [1, 1]} : vector<16x128xf32> to vector<2x128xf32>
    %cst_40 = arith.constant dense<0.000000e+00> : vector<2x128xf32>
    %184 = tpu.matmul %181, %2, %cst_40 {dimension_numbers = #tpu.dot_dimension_numbers<[1], [0], [0], [1], [0, 0, 1, 1], [], []>} : vector<2x32xf32>, vector<32x128xf32>, vector<2x128xf32> -> vector<2x128xf32>
    %185 = arith.addf %183, %184 : vector<2x128xf32>
    %186 = vector.extract_strided_slice %185 {offsets = [0, 0], sizes = [2, 32], strides = [1, 1]} : vector<2x128xf32> to vector<2x32xf32>
    %187 = arith.negf %186 : vector<2x32xf32>
    %188 = math.exp %187 : vector<2x32xf32>
    %cst_41 = arith.constant 1.000000e+00 : f32
    %189 = vector.broadcast %cst_41 : f32 to vector<2x32xf32>
    %190 = arith.addf %189, %188 : vector<2x32xf32>
    %191 = arith.divf %189, %190 : vector<2x32xf32>
    %192 = vector.extract_strided_slice %185 {offsets = [0, 32], sizes = [2, 32], strides = [1, 1]} : vector<2x128xf32> to vector<2x32xf32>
    %193 = arith.negf %192 : vector<2x32xf32>
    %194 = math.exp %193 : vector<2x32xf32>
    %cst_42 = arith.constant 1.000000e+00 : f32
    %195 = vector.broadcast %cst_42 : f32 to vector<2x32xf32>
    %196 = arith.addf %195, %194 : vector<2x32xf32>
    %197 = arith.divf %195, %196 : vector<2x32xf32>
    %198 = vector.extract_strided_slice %185 {offsets = [0, 64], sizes = [2, 32], strides = [1, 1]} : vector<2x128xf32> to vector<2x32xf32>
    %199 = math.tanh %198 : vector<2x32xf32>
    %200 = vector.extract_strided_slice %185 {offsets = [0, 96], sizes = [2, 32], strides = [1, 1]} : vector<2x128xf32> to vector<2x32xf32>
    %201 = arith.negf %200 : vector<2x32xf32>
    %202 = math.exp %201 : vector<2x32xf32>
    %cst_43 = arith.constant 1.000000e+00 : f32
    %203 = vector.broadcast %cst_43 : f32 to vector<2x32xf32>
    %204 = arith.addf %203, %202 : vector<2x32xf32>
    %205 = arith.divf %203, %204 : vector<2x32xf32>
    %206 = arith.mulf %197, %179 : vector<2x32xf32>
    %207 = arith.mulf %191, %199 : vector<2x32xf32>
    %208 = arith.addf %206, %207 : vector<2x32xf32>
    %209 = math.tanh %208 : vector<2x32xf32>
    %210 = arith.mulf %205, %209 : vector<2x32xf32>
    %c12 = arith.constant 12 : index
    %c0_44 = arith.constant 0 : index
    %211 = vector.load %arg10[%c12, %c0_44] : memref<16x32xf32, #tpu.memory_space<vmem>>, vector<2x32xf32>
    tpu.vector_store %arg10[%c12, %c0_44], %210 {strides = array<i32>} : memref<16x32xf32, #tpu.memory_space<vmem>>, vector<2x32xf32>,
    %212 = vector.extract_strided_slice %6 {offsets = [14, 0], sizes = [2, 128], strides = [1, 1]} : vector<16x128xf32> to vector<2x128xf32>
    %cst_45 = arith.constant dense<0.000000e+00> : vector<2x128xf32>
    %213 = tpu.matmul %210, %2, %cst_45 {dimension_numbers = #tpu.dot_dimension_numbers<[1], [0], [0], [1], [0, 0, 1, 1], [], []>} : vector<2x32xf32>, vector<32x128xf32>, vector<2x128xf32> -> vector<2x128xf32>
    %214 = arith.addf %212, %213 : vector<2x128xf32>
    %215 = vector.extract_strided_slice %214 {offsets = [0, 0], sizes = [2, 32], strides = [1, 1]} : vector<2x128xf32> to vector<2x32xf32>
    %216 = arith.negf %215 : vector<2x32xf32>
    %217 = math.exp %216 : vector<2x32xf32>
    %cst_46 = arith.constant 1.000000e+00 : f32
    %218 = vector.broadcast %cst_46 : f32 to vector<2x32xf32>
    %219 = arith.addf %218, %217 : vector<2x32xf32>
    %220 = arith.divf %218, %219 : vector<2x32xf32>
    %221 = vector.extract_strided_slice %214 {offsets = [0, 32], sizes = [2, 32], strides = [1, 1]} : vector<2x128xf32> to vector<2x32xf32>
    %222 = arith.negf %221 : vector<2x32xf32>
    %223 = math.exp %222 : vector<2x32xf32>
    %cst_47 = arith.constant 1.000000e+00 : f32
    %224 = vector.broadcast %cst_47 : f32 to vector<2x32xf32>
    %225 = arith.addf %224, %223 : vector<2x32xf32>
    %226 = arith.divf %224, %225 : vector<2x32xf32>
    %227 = vector.extract_strided_slice %214 {offsets = [0, 64], sizes = [2, 32], strides = [1, 1]} : vector<2x128xf32> to vector<2x32xf32>
    %228 = math.tanh %227 : vector<2x32xf32>
    %229 = vector.extract_strided_slice %214 {offsets = [0, 96], sizes = [2, 32], strides = [1, 1]} : vector<2x128xf32> to vector<2x32xf32>
    %230 = arith.negf %229 : vector<2x32xf32>
    %231 = math.exp %230 : vector<2x32xf32>
    %cst_48 = arith.constant 1.000000e+00 : f32
    %232 = vector.broadcast %cst_48 : f32 to vector<2x32xf32>
    %233 = arith.addf %232, %231 : vector<2x32xf32>
    %234 = arith.divf %232, %233 : vector<2x32xf32>
    %235 = arith.mulf %226, %208 : vector<2x32xf32>
    %236 = arith.mulf %220, %228 : vector<2x32xf32>
    %237 = arith.addf %235, %236 : vector<2x32xf32>
    %238 = math.tanh %237 : vector<2x32xf32>
    %239 = arith.mulf %234, %238 : vector<2x32xf32>
    %c14 = arith.constant 14 : index
    %c0_49 = arith.constant 0 : index
    %240 = vector.load %arg10[%c14, %c0_49] : memref<16x32xf32, #tpu.memory_space<vmem>>, vector<2x32xf32>
    tpu.vector_store %arg10[%c14, %c0_49], %239 {strides = array<i32>} : memref<16x32xf32, #tpu.memory_space<vmem>>, vector<2x32xf32>,
    %c0_50 = arith.constant 0 : index
    %c0_51 = arith.constant 0 : index
    %241 = vector.load %arg10[%c0_50, %c0_51] : memref<16x32xf32, #tpu.memory_space<vmem>>, vector<16x32xf32>
    %c0_52 = arith.constant 0 : index
    %c0_53 = arith.constant 0 : index
    %242 = vector.load %arg4[%c0_52, %c0_53] : memref<32x128xf32, #tpu.memory_space<vmem>>, vector<32x128xf32>
    %c0_54 = arith.constant 0 : index
    %c0_55 = arith.constant 0 : index
    %243 = vector.load %arg5[%c0_54, %c0_55] : memref<32x128xf32, #tpu.memory_space<vmem>>, vector<32x128xf32>
    %c0_56 = arith.constant 0 : index
    %c0_57 = arith.constant 0 : index
    %244 = vector.load %arg6[%c0_56, %c0_57] : memref<1x128xf32, #tpu.memory_space<vmem>>, vector<1x128xf32>
    %cst_58 = arith.constant dense<0.000000e+00> : vector<16x128xf32>
    %245 = tpu.matmul %241, %242, %cst_58 {dimension_numbers = #tpu.dot_dimension_numbers<[1], [0], [0], [1], [0, 0, 1, 1], [], []>} : vector<16x32xf32>, vector<32x128xf32>, vector<16x128xf32> -> vector<16x128xf32>
    %246 = vector.broadcast %244 : vector<1x128xf32> to vector<16x128xf32>
    %247 = arith.addf %245, %246 : vector<16x128xf32>
    %cst_59 = arith.constant 0.000000e+00 : f32
    %248 = vector.broadcast %cst_59 : f32 to vector<2x32xf32>
    %cst_60 = arith.constant 0.000000e+00 : f32
    %249 = vector.broadcast %cst_60 : f32 to vector<2x32xf32>
    %250 = vector.extract_strided_slice %247 {offsets = [0, 0], sizes = [2, 128], strides = [1, 1]} : vector<16x128xf32> to vector<2x128xf32>
    %cst_61 = arith.constant dense<0.000000e+00> : vector<2x128xf32>
    %251 = tpu.matmul %248, %243, %cst_61 {dimension_numbers = #tpu.dot_dimension_numbers<[1], [0], [0], [1], [0, 0, 1, 1], [], []>} : vector<2x32xf32>, vector<32x128xf32>, vector<2x128xf32> -> vector<2x128xf32>
    %252 = arith.addf %250, %251 : vector<2x128xf32>
    %253 = vector.extract_strided_slice %252 {offsets = [0, 0], sizes = [2, 32], strides = [1, 1]} : vector<2x128xf32> to vector<2x32xf32>
    %254 = arith.negf %253 : vector<2x32xf32>
    %255 = math.exp %254 : vector<2x32xf32>
    %cst_62 = arith.constant 1.000000e+00 : f32
    %256 = vector.broadcast %cst_62 : f32 to vector<2x32xf32>
    %257 = arith.addf %256, %255 : vector<2x32xf32>
    %258 = arith.divf %256, %257 : vector<2x32xf32>
    %259 = vector.extract_strided_slice %252 {offsets = [0, 32], sizes = [2, 32], strides = [1, 1]} : vector<2x128xf32> to vector<2x32xf32>
    %260 = arith.negf %259 : vector<2x32xf32>
    %261 = math.exp %260 : vector<2x32xf32>
    %cst_63 = arith.constant 1.000000e+00 : f32
    %262 = vector.broadcast %cst_63 : f32 to vector<2x32xf32>
    %263 = arith.addf %262, %261 : vector<2x32xf32>
    %264 = arith.divf %262, %263 : vector<2x32xf32>
    %265 = vector.extract_strided_slice %252 {offsets = [0, 64], sizes = [2, 32], strides = [1, 1]} : vector<2x128xf32> to vector<2x32xf32>
    %266 = math.tanh %265 : vector<2x32xf32>
    %267 = vector.extract_strided_slice %252 {offsets = [0, 96], sizes = [2, 32], strides = [1, 1]} : vector<2x128xf32> to vector<2x32xf32>
    %268 = arith.negf %267 : vector<2x32xf32>
    %269 = math.exp %268 : vector<2x32xf32>
    %cst_64 = arith.constant 1.000000e+00 : f32
    %270 = vector.broadcast %cst_64 : f32 to vector<2x32xf32>
    %271 = arith.addf %270, %269 : vector<2x32xf32>
    %272 = arith.divf %270, %271 : vector<2x32xf32>
    %273 = arith.mulf %264, %249 : vector<2x32xf32>
    %274 = arith.mulf %258, %266 : vector<2x32xf32>
    %275 = arith.addf %273, %274 : vector<2x32xf32>
    %276 = math.tanh %275 : vector<2x32xf32>
    %277 = arith.mulf %272, %276 : vector<2x32xf32>
    %c0_65 = arith.constant 0 : index
    %c0_66 = arith.constant 0 : index
    %278 = vector.load %arg11[%c0_65, %c0_66] : memref<16x32xf32, #tpu.memory_space<vmem>>, vector<2x32xf32>
    tpu.vector_store %arg11[%c0_65, %c0_66], %277 {strides = array<i32>} : memref<16x32xf32, #tpu.memory_space<vmem>>, vector<2x32xf32>,
    %279 = vector.extract_strided_slice %247 {offsets = [2, 0], sizes = [2, 128], strides = [1, 1]} : vector<16x128xf32> to vector<2x128xf32>
    %cst_67 = arith.constant dense<0.000000e+00> : vector<2x128xf32>
    %280 = tpu.matmul %277, %243, %cst_67 {dimension_numbers = #tpu.dot_dimension_numbers<[1], [0], [0], [1], [0, 0, 1, 1], [], []>} : vector<2x32xf32>, vector<32x128xf32>, vector<2x128xf32> -> vector<2x128xf32>
    %281 = arith.addf %279, %280 : vector<2x128xf32>
    %282 = vector.extract_strided_slice %281 {offsets = [0, 0], sizes = [2, 32], strides = [1, 1]} : vector<2x128xf32> to vector<2x32xf32>
    %283 = arith.negf %282 : vector<2x32xf32>
    %284 = math.exp %283 : vector<2x32xf32>
    %cst_68 = arith.constant 1.000000e+00 : f32
    %285 = vector.broadcast %cst_68 : f32 to vector<2x32xf32>
    %286 = arith.addf %285, %284 : vector<2x32xf32>
    %287 = arith.divf %285, %286 : vector<2x32xf32>
    %288 = vector.extract_strided_slice %281 {offsets = [0, 32], sizes = [2, 32], strides = [1, 1]} : vector<2x128xf32> to vector<2x32xf32>
    %289 = arith.negf %288 : vector<2x32xf32>
    %290 = math.exp %289 : vector<2x32xf32>
    %cst_69 = arith.constant 1.000000e+00 : f32
    %291 = vector.broadcast %cst_69 : f32 to vector<2x32xf32>
    %292 = arith.addf %291, %290 : vector<2x32xf32>
    %293 = arith.divf %291, %292 : vector<2x32xf32>
    %294 = vector.extract_strided_slice %281 {offsets = [0, 64], sizes = [2, 32], strides = [1, 1]} : vector<2x128xf32> to vector<2x32xf32>
    %295 = math.tanh %294 : vector<2x32xf32>
    %296 = vector.extract_strided_slice %281 {offsets = [0, 96], sizes = [2, 32], strides = [1, 1]} : vector<2x128xf32> to vector<2x32xf32>
    %297 = arith.negf %296 : vector<2x32xf32>
    %298 = math.exp %297 : vector<2x32xf32>
    %cst_70 = arith.constant 1.000000e+00 : f32
    %299 = vector.broadcast %cst_70 : f32 to vector<2x32xf32>
    %300 = arith.addf %299, %298 : vector<2x32xf32>
    %301 = arith.divf %299, %300 : vector<2x32xf32>
    %302 = arith.mulf %293, %275 : vector<2x32xf32>
    %303 = arith.mulf %287, %295 : vector<2x32xf32>
    %304 = arith.addf %302, %303 : vector<2x32xf32>
    %305 = math.tanh %304 : vector<2x32xf32>
    %306 = arith.mulf %301, %305 : vector<2x32xf32>
    %c2_71 = arith.constant 2 : index
    %c0_72 = arith.constant 0 : index
    %307 = vector.load %arg11[%c2_71, %c0_72] : memref<16x32xf32, #tpu.memory_space<vmem>>, vector<2x32xf32>
    tpu.vector_store %arg11[%c2_71, %c0_72], %306 {strides = array<i32>} : memref<16x32xf32, #tpu.memory_space<vmem>>, vector<2x32xf32>,
    %308 = vector.extract_strided_slice %247 {offsets = [4, 0], sizes = [2, 128], strides = [1, 1]} : vector<16x128xf32> to vector<2x128xf32>
    %cst_73 = arith.constant dense<0.000000e+00> : vector<2x128xf32>
    %309 = tpu.matmul %306, %243, %cst_73 {dimension_numbers = #tpu.dot_dimension_numbers<[1], [0], [0], [1], [0, 0, 1, 1], [], []>} : vector<2x32xf32>, vector<32x128xf32>, vector<2x128xf32> -> vector<2x128xf32>
    %310 = arith.addf %308, %309 : vector<2x128xf32>
    %311 = vector.extract_strided_slice %310 {offsets = [0, 0], sizes = [2, 32], strides = [1, 1]} : vector<2x128xf32> to vector<2x32xf32>
    %312 = arith.negf %311 : vector<2x32xf32>
    %313 = math.exp %312 : vector<2x32xf32>
    %cst_74 = arith.constant 1.000000e+00 : f32
    %314 = vector.broadcast %cst_74 : f32 to vector<2x32xf32>
    %315 = arith.addf %314, %313 : vector<2x32xf32>
    %316 = arith.divf %314, %315 : vector<2x32xf32>
    %317 = vector.extract_strided_slice %310 {offsets = [0, 32], sizes = [2, 32], strides = [1, 1]} : vector<2x128xf32> to vector<2x32xf32>
    %318 = arith.negf %317 : vector<2x32xf32>
    %319 = math.exp %318 : vector<2x32xf32>
    %cst_75 = arith.constant 1.000000e+00 : f32
    %320 = vector.broadcast %cst_75 : f32 to vector<2x32xf32>
    %321 = arith.addf %320, %319 : vector<2x32xf32>
    %322 = arith.divf %320, %321 : vector<2x32xf32>
    %323 = vector.extract_strided_slice %310 {offsets = [0, 64], sizes = [2, 32], strides = [1, 1]} : vector<2x128xf32> to vector<2x32xf32>
    %324 = math.tanh %323 : vector<2x32xf32>
    %325 = vector.extract_strided_slice %310 {offsets = [0, 96], sizes = [2, 32], strides = [1, 1]} : vector<2x128xf32> to vector<2x32xf32>
    %326 = arith.negf %325 : vector<2x32xf32>
    %327 = math.exp %326 : vector<2x32xf32>
    %cst_76 = arith.constant 1.000000e+00 : f32
    %328 = vector.broadcast %cst_76 : f32 to vector<2x32xf32>
    %329 = arith.addf %328, %327 : vector<2x32xf32>
    %330 = arith.divf %328, %329 : vector<2x32xf32>
    %331 = arith.mulf %322, %304 : vector<2x32xf32>
    %332 = arith.mulf %316, %324 : vector<2x32xf32>
    %333 = arith.addf %331, %332 : vector<2x32xf32>
    %334 = math.tanh %333 : vector<2x32xf32>
    %335 = arith.mulf %330, %334 : vector<2x32xf32>
    %c4_77 = arith.constant 4 : index
    %c0_78 = arith.constant 0 : index
    %336 = vector.load %arg11[%c4_77, %c0_78] : memref<16x32xf32, #tpu.memory_space<vmem>>, vector<2x32xf32>
    tpu.vector_store %arg11[%c4_77, %c0_78], %335 {strides = array<i32>} : memref<16x32xf32, #tpu.memory_space<vmem>>, vector<2x32xf32>,
    %337 = vector.extract_strided_slice %247 {offsets = [6, 0], sizes = [2, 128], strides = [1, 1]} : vector<16x128xf32> to vector<2x128xf32>
    %cst_79 = arith.constant dense<0.000000e+00> : vector<2x128xf32>
    %338 = tpu.matmul %335, %243, %cst_79 {dimension_numbers = #tpu.dot_dimension_numbers<[1], [0], [0], [1], [0, 0, 1, 1], [], []>} : vector<2x32xf32>, vector<32x128xf32>, vector<2x128xf32> -> vector<2x128xf32>
    %339 = arith.addf %337, %338 : vector<2x128xf32>
    %340 = vector.extract_strided_slice %339 {offsets = [0, 0], sizes = [2, 32], strides = [1, 1]} : vector<2x128xf32> to vector<2x32xf32>
    %341 = arith.negf %340 : vector<2x32xf32>
    %342 = math.exp %341 : vector<2x32xf32>
    %cst_80 = arith.constant 1.000000e+00 : f32
    %343 = vector.broadcast %cst_80 : f32 to vector<2x32xf32>
    %344 = arith.addf %343, %342 : vector<2x32xf32>
    %345 = arith.divf %343, %344 : vector<2x32xf32>
    %346 = vector.extract_strided_slice %339 {offsets = [0, 32], sizes = [2, 32], strides = [1, 1]} : vector<2x128xf32> to vector<2x32xf32>
    %347 = arith.negf %346 : vector<2x32xf32>
    %348 = math.exp %347 : vector<2x32xf32>
    %cst_81 = arith.constant 1.000000e+00 : f32
    %349 = vector.broadcast %cst_81 : f32 to vector<2x32xf32>
    %350 = arith.addf %349, %348 : vector<2x32xf32>
    %351 = arith.divf %349, %350 : vector<2x32xf32>
    %352 = vector.extract_strided_slice %339 {offsets = [0, 64], sizes = [2, 32], strides = [1, 1]} : vector<2x128xf32> to vector<2x32xf32>
    %353 = math.tanh %352 : vector<2x32xf32>
    %354 = vector.extract_strided_slice %339 {offsets = [0, 96], sizes = [2, 32], strides = [1, 1]} : vector<2x128xf32> to vector<2x32xf32>
    %355 = arith.negf %354 : vector<2x32xf32>
    %356 = math.exp %355 : vector<2x32xf32>
    %cst_82 = arith.constant 1.000000e+00 : f32
    %357 = vector.broadcast %cst_82 : f32 to vector<2x32xf32>
    %358 = arith.addf %357, %356 : vector<2x32xf32>
    %359 = arith.divf %357, %358 : vector<2x32xf32>
    %360 = arith.mulf %351, %333 : vector<2x32xf32>
    %361 = arith.mulf %345, %353 : vector<2x32xf32>
    %362 = arith.addf %360, %361 : vector<2x32xf32>
    %363 = math.tanh %362 : vector<2x32xf32>
    %364 = arith.mulf %359, %363 : vector<2x32xf32>
    %c6_83 = arith.constant 6 : index
    %c0_84 = arith.constant 0 : index
    %365 = vector.load %arg11[%c6_83, %c0_84] : memref<16x32xf32, #tpu.memory_space<vmem>>, vector<2x32xf32>
    tpu.vector_store %arg11[%c6_83, %c0_84], %364 {strides = array<i32>} : memref<16x32xf32, #tpu.memory_space<vmem>>, vector<2x32xf32>,
    %366 = vector.extract_strided_slice %247 {offsets = [8, 0], sizes = [2, 128], strides = [1, 1]} : vector<16x128xf32> to vector<2x128xf32>
    %cst_85 = arith.constant dense<0.000000e+00> : vector<2x128xf32>
    %367 = tpu.matmul %364, %243, %cst_85 {dimension_numbers = #tpu.dot_dimension_numbers<[1], [0], [0], [1], [0, 0, 1, 1], [], []>} : vector<2x32xf32>, vector<32x128xf32>, vector<2x128xf32> -> vector<2x128xf32>
    %368 = arith.addf %366, %367 : vector<2x128xf32>
    %369 = vector.extract_strided_slice %368 {offsets = [0, 0], sizes = [2, 32], strides = [1, 1]} : vector<2x128xf32> to vector<2x32xf32>
    %370 = arith.negf %369 : vector<2x32xf32>
    %371 = math.exp %370 : vector<2x32xf32>
    %cst_86 = arith.constant 1.000000e+00 : f32
    %372 = vector.broadcast %cst_86 : f32 to vector<2x32xf32>
    %373 = arith.addf %372, %371 : vector<2x32xf32>
    %374 = arith.divf %372, %373 : vector<2x32xf32>
    %375 = vector.extract_strided_slice %368 {offsets = [0, 32], sizes = [2, 32], strides = [1, 1]} : vector<2x128xf32> to vector<2x32xf32>
    %376 = arith.negf %375 : vector<2x32xf32>
    %377 = math.exp %376 : vector<2x32xf32>
    %cst_87 = arith.constant 1.000000e+00 : f32
    %378 = vector.broadcast %cst_87 : f32 to vector<2x32xf32>
    %379 = arith.addf %378, %377 : vector<2x32xf32>
    %380 = arith.divf %378, %379 : vector<2x32xf32>
    %381 = vector.extract_strided_slice %368 {offsets = [0, 64], sizes = [2, 32], strides = [1, 1]} : vector<2x128xf32> to vector<2x32xf32>
    %382 = math.tanh %381 : vector<2x32xf32>
    %383 = vector.extract_strided_slice %368 {offsets = [0, 96], sizes = [2, 32], strides = [1, 1]} : vector<2x128xf32> to vector<2x32xf32>
    %384 = arith.negf %383 : vector<2x32xf32>
    %385 = math.exp %384 : vector<2x32xf32>
    %cst_88 = arith.constant 1.000000e+00 : f32
    %386 = vector.broadcast %cst_88 : f32 to vector<2x32xf32>
    %387 = arith.addf %386, %385 : vector<2x32xf32>
    %388 = arith.divf %386, %387 : vector<2x32xf32>
    %389 = arith.mulf %380, %362 : vector<2x32xf32>
    %390 = arith.mulf %374, %382 : vector<2x32xf32>
    %391 = arith.addf %389, %390 : vector<2x32xf32>
    %392 = math.tanh %391 : vector<2x32xf32>
    %393 = arith.mulf %388, %392 : vector<2x32xf32>
    %c8_89 = arith.constant 8 : index
    %c0_90 = arith.constant 0 : index
    %394 = vector.load %arg11[%c8_89, %c0_90] : memref<16x32xf32, #tpu.memory_space<vmem>>, vector<2x32xf32>
    tpu.vector_store %arg11[%c8_89, %c0_90], %393 {strides = array<i32>} : memref<16x32xf32, #tpu.memory_space<vmem>>, vector<2x32xf32>,
    %395 = vector.extract_strided_slice %247 {offsets = [10, 0], sizes = [2, 128], strides = [1, 1]} : vector<16x128xf32> to vector<2x128xf32>
    %cst_91 = arith.constant dense<0.000000e+00> : vector<2x128xf32>
    %396 = tpu.matmul %393, %243, %cst_91 {dimension_numbers = #tpu.dot_dimension_numbers<[1], [0], [0], [1], [0, 0, 1, 1], [], []>} : vector<2x32xf32>, vector<32x128xf32>, vector<2x128xf32> -> vector<2x128xf32>
    %397 = arith.addf %395, %396 : vector<2x128xf32>
    %398 = vector.extract_strided_slice %397 {offsets = [0, 0], sizes = [2, 32], strides = [1, 1]} : vector<2x128xf32> to vector<2x32xf32>
    %399 = arith.negf %398 : vector<2x32xf32>
    %400 = math.exp %399 : vector<2x32xf32>
    %cst_92 = arith.constant 1.000000e+00 : f32
    %401 = vector.broadcast %cst_92 : f32 to vector<2x32xf32>
    %402 = arith.addf %401, %400 : vector<2x32xf32>
    %403 = arith.divf %401, %402 : vector<2x32xf32>
    %404 = vector.extract_strided_slice %397 {offsets = [0, 32], sizes = [2, 32], strides = [1, 1]} : vector<2x128xf32> to vector<2x32xf32>
    %405 = arith.negf %404 : vector<2x32xf32>
    %406 = math.exp %405 : vector<2x32xf32>
    %cst_93 = arith.constant 1.000000e+00 : f32
    %407 = vector.broadcast %cst_93 : f32 to vector<2x32xf32>
    %408 = arith.addf %407, %406 : vector<2x32xf32>
    %409 = arith.divf %407, %408 : vector<2x32xf32>
    %410 = vector.extract_strided_slice %397 {offsets = [0, 64], sizes = [2, 32], strides = [1, 1]} : vector<2x128xf32> to vector<2x32xf32>
    %411 = math.tanh %410 : vector<2x32xf32>
    %412 = vector.extract_strided_slice %397 {offsets = [0, 96], sizes = [2, 32], strides = [1, 1]} : vector<2x128xf32> to vector<2x32xf32>
    %413 = arith.negf %412 : vector<2x32xf32>
    %414 = math.exp %413 : vector<2x32xf32>
    %cst_94 = arith.constant 1.000000e+00 : f32
    %415 = vector.broadcast %cst_94 : f32 to vector<2x32xf32>
    %416 = arith.addf %415, %414 : vector<2x32xf32>
    %417 = arith.divf %415, %416 : vector<2x32xf32>
    %418 = arith.mulf %409, %391 : vector<2x32xf32>
    %419 = arith.mulf %403, %411 : vector<2x32xf32>
    %420 = arith.addf %418, %419 : vector<2x32xf32>
    %421 = math.tanh %420 : vector<2x32xf32>
    %422 = arith.mulf %417, %421 : vector<2x32xf32>
    %c10_95 = arith.constant 10 : index
    %c0_96 = arith.constant 0 : index
    %423 = vector.load %arg11[%c10_95, %c0_96] : memref<16x32xf32, #tpu.memory_space<vmem>>, vector<2x32xf32>
    tpu.vector_store %arg11[%c10_95, %c0_96], %422 {strides = array<i32>} : memref<16x32xf32, #tpu.memory_space<vmem>>, vector<2x32xf32>,
    %424 = vector.extract_strided_slice %247 {offsets = [12, 0], sizes = [2, 128], strides = [1, 1]} : vector<16x128xf32> to vector<2x128xf32>
    %cst_97 = arith.constant dense<0.000000e+00> : vector<2x128xf32>
    %425 = tpu.matmul %422, %243, %cst_97 {dimension_numbers = #tpu.dot_dimension_numbers<[1], [0], [0], [1], [0, 0, 1, 1], [], []>} : vector<2x32xf32>, vector<32x128xf32>, vector<2x128xf32> -> vector<2x128xf32>
    %426 = arith.addf %424, %425 : vector<2x128xf32>
    %427 = vector.extract_strided_slice %426 {offsets = [0, 0], sizes = [2, 32], strides = [1, 1]} : vector<2x128xf32> to vector<2x32xf32>
    %428 = arith.negf %427 : vector<2x32xf32>
    %429 = math.exp %428 : vector<2x32xf32>
    %cst_98 = arith.constant 1.000000e+00 : f32
    %430 = vector.broadcast %cst_98 : f32 to vector<2x32xf32>
    %431 = arith.addf %430, %429 : vector<2x32xf32>
    %432 = arith.divf %430, %431 : vector<2x32xf32>
    %433 = vector.extract_strided_slice %426 {offsets = [0, 32], sizes = [2, 32], strides = [1, 1]} : vector<2x128xf32> to vector<2x32xf32>
    %434 = arith.negf %433 : vector<2x32xf32>
    %435 = math.exp %434 : vector<2x32xf32>
    %cst_99 = arith.constant 1.000000e+00 : f32
    %436 = vector.broadcast %cst_99 : f32 to vector<2x32xf32>
    %437 = arith.addf %436, %435 : vector<2x32xf32>
    %438 = arith.divf %436, %437 : vector<2x32xf32>
    %439 = vector.extract_strided_slice %426 {offsets = [0, 64], sizes = [2, 32], strides = [1, 1]} : vector<2x128xf32> to vector<2x32xf32>
    %440 = math.tanh %439 : vector<2x32xf32>
    %441 = vector.extract_strided_slice %426 {offsets = [0, 96], sizes = [2, 32], strides = [1, 1]} : vector<2x128xf32> to vector<2x32xf32>
    %442 = arith.negf %441 : vector<2x32xf32>
    %443 = math.exp %442 : vector<2x32xf32>
    %cst_100 = arith.constant 1.000000e+00 : f32
    %444 = vector.broadcast %cst_100 : f32 to vector<2x32xf32>
    %445 = arith.addf %444, %443 : vector<2x32xf32>
    %446 = arith.divf %444, %445 : vector<2x32xf32>
    %447 = arith.mulf %438, %420 : vector<2x32xf32>
    %448 = arith.mulf %432, %440 : vector<2x32xf32>
    %449 = arith.addf %447, %448 : vector<2x32xf32>
    %450 = math.tanh %449 : vector<2x32xf32>
    %451 = arith.mulf %446, %450 : vector<2x32xf32>
    %c12_101 = arith.constant 12 : index
    %c0_102 = arith.constant 0 : index
    %452 = vector.load %arg11[%c12_101, %c0_102] : memref<16x32xf32, #tpu.memory_space<vmem>>, vector<2x32xf32>
    tpu.vector_store %arg11[%c12_101, %c0_102], %451 {strides = array<i32>} : memref<16x32xf32, #tpu.memory_space<vmem>>, vector<2x32xf32>,
    %453 = vector.extract_strided_slice %247 {offsets = [14, 0], sizes = [2, 128], strides = [1, 1]} : vector<16x128xf32> to vector<2x128xf32>
    %cst_103 = arith.constant dense<0.000000e+00> : vector<2x128xf32>
    %454 = tpu.matmul %451, %243, %cst_103 {dimension_numbers = #tpu.dot_dimension_numbers<[1], [0], [0], [1], [0, 0, 1, 1], [], []>} : vector<2x32xf32>, vector<32x128xf32>, vector<2x128xf32> -> vector<2x128xf32>
    %455 = arith.addf %453, %454 : vector<2x128xf32>
    %456 = vector.extract_strided_slice %455 {offsets = [0, 0], sizes = [2, 32], strides = [1, 1]} : vector<2x128xf32> to vector<2x32xf32>
    %457 = arith.negf %456 : vector<2x32xf32>
    %458 = math.exp %457 : vector<2x32xf32>
    %cst_104 = arith.constant 1.000000e+00 : f32
    %459 = vector.broadcast %cst_104 : f32 to vector<2x32xf32>
    %460 = arith.addf %459, %458 : vector<2x32xf32>
    %461 = arith.divf %459, %460 : vector<2x32xf32>
    %462 = vector.extract_strided_slice %455 {offsets = [0, 32], sizes = [2, 32], strides = [1, 1]} : vector<2x128xf32> to vector<2x32xf32>
    %463 = arith.negf %462 : vector<2x32xf32>
    %464 = math.exp %463 : vector<2x32xf32>
    %cst_105 = arith.constant 1.000000e+00 : f32
    %465 = vector.broadcast %cst_105 : f32 to vector<2x32xf32>
    %466 = arith.addf %465, %464 : vector<2x32xf32>
    %467 = arith.divf %465, %466 : vector<2x32xf32>
    %468 = vector.extract_strided_slice %455 {offsets = [0, 64], sizes = [2, 32], strides = [1, 1]} : vector<2x128xf32> to vector<2x32xf32>
    %469 = math.tanh %468 : vector<2x32xf32>
    %470 = vector.extract_strided_slice %455 {offsets = [0, 96], sizes = [2, 32], strides = [1, 1]} : vector<2x128xf32> to vector<2x32xf32>
    %471 = arith.negf %470 : vector<2x32xf32>
    %472 = math.exp %471 : vector<2x32xf32>
    %cst_106 = arith.constant 1.000000e+00 : f32
    %473 = vector.broadcast %cst_106 : f32 to vector<2x32xf32>
    %474 = arith.addf %473, %472 : vector<2x32xf32>
    %475 = arith.divf %473, %474 : vector<2x32xf32>
    %476 = arith.mulf %467, %449 : vector<2x32xf32>
    %477 = arith.mulf %461, %469 : vector<2x32xf32>
    %478 = arith.addf %476, %477 : vector<2x32xf32>
    %479 = math.tanh %478 : vector<2x32xf32>
    %480 = arith.mulf %475, %479 : vector<2x32xf32>
    %c14_107 = arith.constant 14 : index
    %c0_108 = arith.constant 0 : index
    %481 = vector.load %arg11[%c14_107, %c0_108] : memref<16x32xf32, #tpu.memory_space<vmem>>, vector<2x32xf32>
    tpu.vector_store %arg11[%c14_107, %c0_108], %480 {strides = array<i32>} : memref<16x32xf32, #tpu.memory_space<vmem>>, vector<2x32xf32>,
    %c0_109 = arith.constant 0 : index
    %c0_110 = arith.constant 0 : index
    %482 = vector.load %arg11[%c0_109, %c0_110] : memref<16x32xf32, #tpu.memory_space<vmem>>, vector<16x32xf32>
    %c0_111 = arith.constant 0 : index
    %c0_112 = arith.constant 0 : index
    %483 = vector.load %arg7[%c0_111, %c0_112] : memref<32x4xf32, #tpu.memory_space<vmem>>, vector<32x4xf32>
    %cst_113 = arith.constant dense<0.000000e+00> : vector<16x4xf32>
    %484 = tpu.matmul %482, %483, %cst_113 {dimension_numbers = #tpu.dot_dimension_numbers<[1], [0], [0], [1], [0, 0, 1, 1], [], []>} : vector<16x32xf32>, vector<32x4xf32>, vector<16x4xf32> -> vector<16x4xf32>
    %c0_114 = arith.constant 0 : index
    %c0_115 = arith.constant 0 : index
    %485 = vector.load %arg8[%c0_114, %c0_115] : memref<1x4xf32, #tpu.memory_space<vmem>>, vector<1x4xf32>
    %486 = vector.broadcast %485 : vector<1x4xf32> to vector<16x4xf32>
    %487 = arith.addf %484, %486 : vector<16x4xf32>
    %c0_116 = arith.constant 0 : index
    %c0_117 = arith.constant 0 : index
    %488 = vector.load %arg9[%c0_116, %c0_117] : memref<16x4xf32, #tpu.memory_space<vmem>>, vector<16x4xf32>
    tpu.vector_store %arg9[%c0_116, %c0_117], %487 {strides = array<i32>} : memref<16x4xf32, #tpu.memory_space<vmem>>, vector<16x4xf32>,
    return
  }
}

</mosaic_0001>

<bundles_post_ra>
// kernel: recurrent_module_forward.1
= control target key start
LH: loop header
LB: loop body
LE: loop exit
PB: predicated region body
PF: predicated region fallthrough
CT: control target
= control target key end

     0   :  { %14 = vsyncpa [#allocation5], 0  ;;  %s3162_s0 = inlined_call_operand.vmem [shape: f32[16,16], index: 0, kind: input, shape index: {}]   ;;  %s3163_s1 = inlined_call_operand.hbm [shape: f32[16,128], index: 1, kind: input, shape index: {}]   ;;  %s3164_s2 = inlined_call_operand.vmem [shape: f32[32,128], index: 2, kind: input, shape index: {}]   ;;  %s3165_s3 = inlined_call_operand.vmem [shape: f32[1,128], index: 3, kind: input, shape index: {}]   ;;  %s3166_s4 = inlined_call_operand.vmem [shape: f32[32,128], index: 4, kind: input, shape index: {}]   ;;  %s3167_s5 = inlined_call_operand.vmem [shape: f32[32,128], index: 5, kind: input, shape index: {}]   ;;  %s3168_s6 = inlined_call_operand.vmem [shape: f32[1,128], index: 6, kind: input, shape index: {}]   ;;  %s3169_s7 = inlined_call_operand.vmem [shape: f32[32,4], index: 7, kind: input, shape index: {}]   ;;  %s3170_s8 = inlined_call_operand.hbm [shape: f32[1,4], index: 8, kind: input, shape index: {}]   ;;  %s3171_s9 = inlined_call_operand.vmem [shape: f32[16,4], index: 9, kind: output, shape index: {}]  }
   0x1   :  { %15 = vsyncpa [#allocation7], 0  ;;  %s2741_s30 = smov [#allocation4]   ;;  %s2693_s13 = scalar_lea.hbm %s3163_s1, 256 }
   0x2   :  { %s23_s10 = sshll.u32 %s2741_s30, 4  ;;  %p2694_p0 = scmp.ne.s32.totalorder %s3163_s1, %s2693_s13  ;;  %s24_s10 = int_to_ptr.vmem [resolvable:$true] %s23_s10 }
   0x3   :  { %p2697_p1 = scmp.lt.u32.totalorder %s2693_s13, %s3163_s1 }
   0x5   :  { %p2699_p2 = pnand %p2697_p1, %p2694_p0 }
   0x7   :  { %2702 = shalt.err (!%p2699_p2)
}
   0x8   :  { %s2703_s18 = scalar_lea.vmem %s24_s10, 256  ;;  %p2708_p4 = scmp.lt.s32.totalorder %s24_s10, %s24_s10 }
   0x9   :  { %p2704_p3 = scmp.ne.s32.totalorder %s24_s10, %s2703_s18  ;;  %p2709_p5 = scmp.lt.s32.totalorder %s2703_s18, %s2703_s18 }
   0xb   :  { %p2710_p6 = por %p2709_p5, %p2708_p4 }
   0xd   :  { %p2711_p7 = pnand %p2710_p6, %p2704_p3 }
   0xf   :  { %2714 = shalt.err (!%p2711_p7)
}
  0x10   :  { %s2742_s19 = smov 128   ;;  %s2743_s20 = smov 8  }
  0x11   :  { %29 = dma.hbm_to_vmem [thread:$0]  %s3163_s1, 256, %s24_s10, [#allocation5], %s2742_s19, %s2742_s19, %s2743_s20  }
  0x12   :  { %s2744_s23 = smov [#allocation6]   ;;  %s2715_s27 = scalar_lea.hbm %s3170_s8, 16 }
  0x13   :  { %s48_s24 = sshll.u32 %s2744_s23, 4  ;;  %p2716_p8 = scmp.ne.s32.totalorder %s3170_s8, %s2715_s27  ;;  %s49_s24 = int_to_ptr.vmem [resolvable:$true] %s48_s24 }
  0x14   :  { %p2719_p9 = scmp.lt.u32.totalorder %s2715_s27, %s3170_s8 }
  0x16   :  { %p2721_p10 = pnand %p2719_p9, %p2716_p8 }
  0x18   :  { %2724 = shalt.err (!%p2721_p10)
}
  0x19   :  { %s2725_s12 = scalar_lea.vmem %s49_s24, 16  ;;  %s2729_s1 = scalar_lea.vmem %s49_s24, 32 }
  0x1a   :  { %p2726_p11 = scmp.ne.s32.totalorder %s49_s24, %s2725_s12  ;;  %p2730_p12 = scmp.lt.s32.totalorder %s49_s24, %s49_s24 }
  0x1b   :  { %p2731_p13 = scmp.lt.s32.totalorder %s2729_s1, %s2725_s12 }
  0x1d   :  { %p2732_p0 = por %p2731_p13, %p2730_p12 }
  0x1f   :  { %p2733_p1 = pnand %p2732_p0, %p2726_p11 }
  0x21   :  { %2736 = shalt.err (!%p2733_p1)
}
  0x22   :  { %51 = dma.hbm_to_vmem [thread:$0]  %s3170_s8, 16, %s49_s24, [#allocation7]  }
  0x23   :  { %2737 = dma.done.wait [#allocation5], 256  }
  0x24   :  { %2738 = vsyncadd [#allocation5], 4294967040 }
  0x25   :  { %2739 = dma.done.wait [#allocation7], 16  }
  0x26   :  { %2740 = vsyncadd [#allocation7], 4294967280  ;;  %v2745_v0 = vmov 0.0|0.0   ;;  %vm2746_vm0 = vmmov 0   ;;  %v2747_v1 = vmov 0.0   ;;  %vm73_vm1 = vcmask 130048  }
  0x27   :  { %2444 = vmatprep.subr.bf16.mxu1 %v2745_v0  ;;  %2250 = vmatprep.mubr.msk.f32.mxu1 %vm2746_vm0, %v2747_v1  ;;  %v60_v2 = vld [vmem:[#allocation4] sm:$0xff]  ;;  %v61_v3 = vld [vmem:[#allocation4 + $0x8] sm:$0xff]  ;;  %v64_v9 = vld [vmem:[%s3164_s2 + $0x10] sm:$0xff]  ;;  %s2748_s25 = smov 64   ;;  %vm258_vm2 = vcmask 254976   ;;  %vm155_vm3 = vcmask 261120  }
  0x28   :  { %v62_v4 = vld [vmem:[%s3164_s2] sm:$0xff]  ;;  %v2440_v5 = vpack.c.bf16 %v61_v3, %v60_v2  ;;  %v63_v6 = vld [vmem:[%s3164_s2 + $0x8] sm:$0xff]  ;;  %v65_v10 = vld [vmem:[%s3164_s2 + $0x18] sm:$0xff]  ;;  %vm367_vm4 = vcmask 257026   ;;  %vm591_vm5 = vcmask 261126   ;;  %vm479_vm6 = vcmask 259076  }
  0x29   :  { %v58_v7 = vld [vmem:[%s3162_s0] sm:$0xff]  ;;  %v2836_v8 = vpack.c.bf16 %v63_v6, %v62_v4  ;;  %v59_v11 = vld [vmem:[%s3162_s0 + $0x8] sm:$0xff]  ;;  %v2849_v12 = vpack.c.bf16 %v65_v10, %v64_v9  ;;  %vm2091_vm7 = vcmask 31744  }
  0x2a   :  { %2239 = vmatprep.mubr.msk.f32.mxu0 %vm73_vm1, %v58_v7  ;;  %2441 = vmatprep.subr.bf16.mxu0 %v2440_v5  ;;  %v2100_v13 = vld [vmem:[%s3165_s3] ss:$0 sm:$0xff]  ;;  %s2749_s3 = smov 32  }
  0x2b   :  { %2446 = vmatpush3.bf16.msra.mxu1 %v2836_v8  ;;  %2443 = vmatpush3.bf16.msra.mxu0 %v2440_v5 }
  0x2c   :  { %2447 = vmatprep.subr.bf16.mxu1 %v2745_v0  ;;  %2450 = vmatprep.subr.bf16.mxu0 %v2745_v0 }
  0x2e   :  { %2240 = vmatmul.mubr.msk.f32.vlgmr.msra.gmra.mrb[0].mxu0 %vm73_vm1, %v59_v11 }
  0x2f   :  { %2449 = vmatpush3.bf16.msra.mxu1 %v2849_v12  ;;  %2452 = vmatpush3.bf16.msra.mxu0 %v2836_v8 }
  0x30   :  { %2453 = vmatprep.subr.bf16.mxu0 %v2745_v0  ;;  %2261 = vmatprep.mubr.msk.f32.mxu0 %vm2746_vm0, %v2747_v1 }
  0x31   :  { %2456 = vmatprep.subr.bf16.mxu1 %v2745_v0 }
  0x32   :  { %2251 = vmatmul.mubr.f32.vlgmr.msra.gmra.mrb[0].mxu1 %v2747_v1 }
  0x33   :  { %2455 = vmatpush3.bf16.msra.mxu0 %v2849_v12  ;;  %2458 = vmatpush3.bf16.msra.mxu1 %v2836_v8 }
  0x34   :  { %2459 = vmatprep.subr.bf16.mxu1 %v2745_v0  ;;  %2272 = vmatprep.mubr.msk.f32.mxu1 %vm2746_vm0, %v2747_v1 }
  0x35   :  { %2462 = vmatprep.subr.bf16.mxu0 %v2745_v0 }
  0x37   :  { %2461 = vmatpush3.bf16.msra.mxu1 %v2849_v12 }
  0x38   :  { %2468 = vmatprep.subr.bf16.mxu1 %v2745_v0 }
 0x101   :  { %v2241_v14 = vpop.f32.mrb[0].mxu0 }
 0x102   :  { %v2872_v15 = vadd.f32 %v2241_v14, %v2100_v13  ;;  %v146_v16 = vpop.f32.mrb[1].mxu0 }
 0x103   :  { %v2874_v17 = vadd.f32 %v2100_v13, %v146_v16 }
 0x105   :  { %v225_v18 = vpop.f32.mrb[0].mxu1 }
 0x106   :  { %v229_v19 = vadd.f32 %v225_v18, %v2874_v17  ;;  %v2252_v20 = vpop.f32.mrb[1].mxu1 }
 0x108   :  { %2565 = vtanh.f32 %v229_v19  ;;  %v2103_v22 = vmul.f32 -1.442695, %v229_v19 }
 0x10a   :  { %2567 = vpow2.f32 %v2103_v22 }
 0x112   :  { %v2566_v21 = vpop.eup %2565 }
 0x113   :  { %239 = vrot.lane.b32.xlu0 %v2566_v21, %s2748_s25 }
 0x114   :  { %v2568_v23 = vpop.eup %2567 }
 0x115   :  { %v233_v24 = vadd.f32 1.0, %v2568_v23 }
 0x117   :  { %2569 = vrcp.f32 %v233_v24 }
 0x121   :  { %v2570_v25 = vpop.eup %2569 }
 0x122   :  { %v237_v28 = vmul.f32 0.0, %v2570_v25 }
 0x185   :  { %v240_v26 = vpop.permute.xlu0 %239 }
 0x186   :  { %v242_v27 = vmul.f32 %v2570_v25, %v240_v26 }
 0x188   :  { %244 = vrot.lane.b32.xlu0 %v242_v27, %s2749_s3 }
 0x1fa   :  { %v245_v29 = vpop.permute.xlu0 %244 }
 0x1fb   :  { %v247_v30 = vadd.f32 %v245_v29, %v237_v28 }
 0x1fd   :  { %2571 = vtanh.f32 %v247_v30  ;;  %v344_v46 = vrot.slane %v247_v30, 6 }
 0x207   :  { %v2572_v31 = vpop.eup %2571 }
 0x208   :  { %250 = vrot.lane.b32.xlu1 %v2572_v31, %s2748_s25 }
 0x27a   :  { %v251_v32 = vpop.permute.xlu1 %250 }
 0x27b   :  { %v253_v33 = vmul.f32 %v2570_v25, %v251_v32 }
 0x27d   :  { %255 = vrot.lane.b32.xlu1 %v253_v33, %s2749_s3 }
 0x2ef   :  { %v256_v34 = vpop.permute.xlu1 %255 }
 0x2f0   :  { %259 = vst.msk [vmem:[#allocation2] sm:$0x3] %vm258_vm2, %v256_v34  ;;  %2262 = vmatmul.mubr.msk.f32.vlgmr.msra.gmra.mrb[2].mxu0 %vm155_vm3, %v256_v34 }
 0x2f1   :  { %2464 = vmatpush3.bf16.msra.mxu0 %v2836_v8  ;;  %2283 = vmatprep.mubr.msk.f32.mxu0 %vm2746_vm0, %v2747_v1 }
 0x2f2   :  { %2465 = vmatprep.subr.bf16.mxu0 %v2745_v0 }
 0x2f5   :  { %2467 = vmatpush3.bf16.msra.mxu0 %v2849_v12 }
 0x2f6   :  { %2474 = vmatprep.subr.bf16.mxu0 %v2745_v0 }
 0x3c3   :  { %v328_v35 = vpop.f32.mrb[2].mxu0 }
 0x3c4   :  { %v333_v36 = vrot.slane %v328_v35, 6  ;;  %v2263_v37 = vpop.f32.mrb[3].mxu0 }
 0x3c6   :  { %v335_v38 = vadd.f32 %v333_v36, %v2874_v17 }
 0x3c8   :  { %2573 = vtanh.f32 %v335_v38  ;;  %v2105_v40 = vmul.f32 -1.442695, %v335_v38 }
 0x3ca   :  { %2575 = vpow2.f32 %v2105_v40 }
 0x3d2   :  { %v2574_v39 = vpop.eup %2573 }
 0x3d3   :  { %348 = vrot.lane.b32.xlu0 %v2574_v39, %s2748_s25 }
 0x3d4   :  { %v2576_v41 = vpop.eup %2575 }
 0x3d5   :  { %v339_v42 = vadd.f32 1.0, %v2576_v41 }
 0x3d7   :  { %2577 = vrcp.f32 %v339_v42 }
 0x3e1   :  { %v2578_v43 = vpop.eup %2577 }
 0x3e2   :  { %v346_v47 = vmul.f32 %v2578_v43, %v344_v46 }
 0x445   :  { %v349_v44 = vpop.permute.xlu0 %348 }
 0x446   :  { %v351_v45 = vmul.f32 %v2578_v43, %v349_v44 }
 0x448   :  { %353 = vrot.lane.b32.xlu1 %v351_v45, %s2749_s3 }
 0x4ba   :  { %v354_v48 = vpop.permute.xlu1 %353 }
 0x4bb   :  { %v356_v49 = vadd.f32 %v354_v48, %v346_v47 }
 0x4bd   :  { %2579 = vtanh.f32 %v356_v49  ;;  %v456_v4 = vrot.slane %v356_v49, 6 }
 0x4c7   :  { %v2580_v50 = vpop.eup %2579 }
 0x4c8   :  { %359 = vrot.lane.b32.xlu0 %v2580_v50, %s2748_s25 }
 0x53a   :  { %v360_v51 = vpop.permute.xlu0 %359 }
 0x53b   :  { %v2893_v52 = vmul.f32 %v2578_v43, %v360_v51 }
 0x53d   :  { %v369_v53 = vrot.slane %v2893_v52, 2 }
 0x53f   :  { %370 = vrot.lane.b32.xlu1 %v369_v53, %s2749_s3 }
 0x5b1   :  { %v371_v54 = vpop.permute.xlu1 %370 }
 0x5b2   :  { %2273 = vmatmul.mubr.msk.f32.vlgmr.msra.gmra.mrb[2].mxu1 %vm155_vm3, %v371_v54 }
 0x5b3   :  { %2470 = vmatpush3.bf16.msra.mxu1 %v2836_v8  ;;  %2294 = vmatprep.mubr.msk.f32.mxu1 %vm2746_vm0, %v2747_v1 }
 0x5b4   :  { %2471 = vmatprep.subr.bf16.mxu1 %v2745_v0 }
 0x5b7   :  { %2473 = vmatpush3.bf16.msra.mxu1 %v2849_v12 }
 0x5b8   :  { %2480 = vmatprep.subr.bf16.mxu1 %v2745_v0 }
 0x685   :  { %v440_v55 = vpop.f32.mrb[2].mxu1 }
 0x686   :  { %v445_v56 = vrot.slane %v440_v55, 4  ;;  %v2274_v57 = vpop.f32.mrb[3].mxu1 }
 0x688   :  { %v447_v58 = vadd.f32 %v445_v56, %v2874_v17 }
 0x68a   :  { %2581 = vtanh.f32 %v447_v58  ;;  %v2107_v60 = vmul.f32 -1.442695, %v447_v58 }
 0x68c   :  { %2583 = vpow2.f32 %v2107_v60 }
 0x694   :  { %v2582_v59 = vpop.eup %2581 }
 0x695   :  { %460 = vrot.lane.b32.xlu0 %v2582_v59, %s2748_s25 }
 0x696   :  { %v2584_v61 = vpop.eup %2583 }
 0x697   :  { %v451_v62 = vadd.f32 1.0, %v2584_v61 }
 0x699   :  { %2585 = vrcp.f32 %v451_v62 }
 0x6a3   :  { %v2586_v63 = vpop.eup %2585 }
 0x6a4   :  { %v458_v5 = vmul.f32 %v2586_v63, %v456_v4 }
 0x707   :  { %v461_v2 = vpop.permute.xlu0 %460 }
 0x708   :  { %v463_v3 = vmul.f32 %v2586_v63, %v461_v2 }
 0x70a   :  { %465 = vrot.lane.b32.xlu1 %v463_v3, %s2749_s3 }
 0x77c   :  { %v466_v6 = vpop.permute.xlu1 %465 }
 0x77d   :  { %v468_v7 = vadd.f32 %v466_v6, %v458_v5 }
 0x77f   :  { %2587 = vtanh.f32 %v468_v7  ;;  %v568_v28 = vrot.slane %v468_v7, 6 }
 0x789   :  { %v2588_v9 = vpop.eup %2587 }
 0x78a   :  { %471 = vrot.lane.b32.xlu0 %v2588_v9, %s2748_s25 }
 0x7fc   :  { %v472_v10 = vpop.permute.xlu0 %471 }
 0x7fd   :  { %v2908_v11 = vmul.f32 %v2586_v63, %v472_v10 }
 0x7ff   :  { %v481_v13 = vrot.slane %v2908_v11, 4 }
 0x801   :  { %482 = vrot.lane.b32.xlu1 %v481_v13, %s2749_s3 }
 0x873   :  { %v483_v14 = vpop.permute.xlu1 %482 }
 0x874   :  { %2284 = vmatmul.mubr.msk.f32.vlgmr.msra.gmra.mrb[4].mxu0 %vm155_vm3, %v483_v14 }
 0x875   :  { %2476 = vmatpush3.bf16.msra.mxu0 %v2836_v8  ;;  %2305 = vmatprep.mubr.msk.f32.mxu0 %vm2746_vm0, %v2747_v1 }
 0x876   :  { %2477 = vmatprep.subr.bf16.mxu0 %v2745_v0 }
 0x879   :  { %2479 = vmatpush3.bf16.msra.mxu0 %v2849_v12 }
 0x87a   :  { %2486 = vmatprep.subr.bf16.mxu0 %v2745_v0 }
 0x947   :  { %v552_v16 = vpop.f32.mrb[4].mxu0 }
 0x948   :  { %v557_v18 = vrot.slane %v552_v16, 2  ;;  %v2285_v19 = vpop.f32.mrb[5].mxu0 }
 0x94a   :  { %v559_v20 = vadd.f32 %v557_v18, %v2874_v17 }
 0x94c   :  { %2589 = vtanh.f32 %v559_v20  ;;  %v2109_v22 = vmul.f32 -1.442695, %v559_v20 }
 0x94e   :  { %2591 = vpow2.f32 %v2109_v22 }
 0x956   :  { %v2590_v21 = vpop.eup %2589 }
 0x957   :  { %572 = vrot.lane.b32.xlu0 %v2590_v21, %s2748_s25 }
 0x958   :  { %v2592_v23 = vpop.eup %2591 }
 0x959   :  { %v563_v24 = vadd.f32 1.0, %v2592_v23 }
 0x95b   :  { %2593 = vrcp.f32 %v563_v24 }
 0x965   :  { %v2594_v25 = vpop.eup %2593 }
 0x966   :  { %v570_v29 = vmul.f32 %v2594_v25, %v568_v28 }
 0x9c9   :  { %v573_v26 = vpop.permute.xlu0 %572 }
 0x9ca   :  { %v575_v27 = vmul.f32 %v2594_v25, %v573_v26 }
 0x9cc   :  { %577 = vrot.lane.b32.xlu1 %v575_v27, %s2749_s3 }
 0xa3e   :  { %v578_v30 = vpop.permute.xlu1 %577 }
 0xa3f   :  { %v580_v31 = vadd.f32 %v578_v30, %v570_v29 }
 0xa41   :  { %2595 = vtanh.f32 %v580_v31  ;;  %v677_v46 = vrot.slane %v580_v31, 6 }
 0xa4b   :  { %v2596_v17 = vpop.eup %2595 }
 0xa4c   :  { %583 = vrot.lane.b32.xlu0 %v2596_v17, %s2748_s25 }
 0xabe   :  { %v584_v32 = vpop.permute.xlu0 %583 }
 0xabf   :  { %v2923_v33 = vmul.f32 %v2594_v25, %v584_v32 }
 0xac1   :  { %v593_v34 = vrot.slane %v2923_v33, 6 }
 0xac3   :  { %594 = vrot.lane.b32.xlu1 %v593_v34, %s2749_s3 }
 0xb35   :  { %v595_v35 = vpop.permute.xlu1 %594 }
 0xb36   :  { %2295 = vmatmul.mubr.msk.f32.vlgmr.msra.gmra.mrb[4].mxu1 %vm155_vm3, %v595_v35 }
 0xb37   :  { %2482 = vmatpush3.bf16.msra.mxu1 %v2836_v8  ;;  %2316 = vmatprep.mubr.msk.f32.mxu1 %vm2746_vm0, %v2747_v1 }
 0xb38   :  { %2483 = vmatprep.subr.bf16.mxu1 %v2745_v0 }
 0xb3b   :  { %2485 = vmatpush3.bf16.msra.mxu1 %v2849_v12 }
 0xc09   :  { %v664_v36 = vpop.f32.mrb[4].mxu1 }
 0xc0a   :  { %v668_v37 = vadd.f32 %v664_v36, %v2872_v15  ;;  %v2296_v38 = vpop.f32.mrb[5].mxu1 }
 0xc0c   :  { %2597 = vtanh.f32 %v668_v37  ;;  %v2111_v40 = vmul.f32 -1.442695, %v668_v37 }
 0xc0e   :  { %2599 = vpow2.f32 %v2111_v40 }
 0xc16   :  { %v2598_v39 = vpop.eup %2597 }
 0xc17   :  { %681 = vrot.lane.b32.xlu0 %v2598_v39, %s2748_s25 }
 0xc18   :  { %v2600_v41 = vpop.eup %2599 }
 0xc19   :  { %v672_v42 = vadd.f32 1.0, %v2600_v41 }
 0xc1b   :  { %2601 = vrcp.f32 %v672_v42 }
 0xc25   :  { %v2602_v43 = vpop.eup %2601 }
 0xc26   :  { %v679_v47 = vmul.f32 %v2602_v43, %v677_v46 }
 0xc89   :  { %v682_v44 = vpop.permute.xlu0 %681 }
 0xc8a   :  { %v684_v45 = vmul.f32 %v2602_v43, %v682_v44 }
 0xc8c   :  { %686 = vrot.lane.b32.xlu1 %v684_v45, %s2749_s3 }
 0xcfe   :  { %v687_v48 = vpop.permute.xlu1 %686 }
 0xcff   :  { %v689_v49 = vadd.f32 %v687_v48, %v679_v47 }
 0xd01   :  { %2603 = vtanh.f32 %v689_v49 }
 0xd0b   :  { %v2604_v50 = vpop.eup %2603 }
 0xd0c   :  { %692 = vrot.lane.b32.xlu0 %v2604_v50, %s2748_s25 }
 0xd7e   :  { %v693_v51 = vpop.permute.xlu0 %692 }
 0xd7f   :  { %v695_v53 = vmul.f32 %v2602_v43, %v693_v51 }
 0xd81   :  { %697 = vrot.lane.b32.xlu1 %v695_v53, %s2749_s3 }
 0xdf3   :  { %v698_v54 = vpop.permute.xlu1 %697 }
 0xdf4   :  { %700 = vst.msk [vmem:[#allocation2 + $0x8] sm:$0x3] %vm258_vm2, %v698_v54  ;;  %2306 = vmatmul.mubr.msk.f32.vlgmr.msra.gmra.mrb[6].mxu0 %vm155_vm3, %v698_v54  ;;  %v1034_v54 = vld [vmem:[%s3166_s4 + $0x8] sm:$0xff] }
 0xdf5   :  { %2488 = vmatpush3.bf16.msra.mxu0 %v2836_v8  ;;  %2327 = vmatprep.mubr.msk.f32.mxu0 %vm2746_vm0, %v2747_v1 }
 0xdf6   :  { %2489 = vmatprep.subr.bf16.mxu0 %v2745_v0 }
 0xdf9   :  { %2491 = vmatpush3.bf16.msra.mxu0 %v2849_v12  ;;  %v785_v12 = vrot.slane %v689_v49, 6 }
 0xdfa   :  { %2500 = vmatprep.subr.bf16.mxu0 %v2745_v0 }
 0xec7   :  { %v769_v55 = vpop.f32.mrb[6].mxu0 }
 0xec8   :  { %v774_v56 = vrot.slane %v769_v55, 6  ;;  %v2307_v57 = vpop.f32.mrb[7].mxu0 }
 0xec9   :  { %v1035_v57 = vld [vmem:[%s3166_s4 + $0x10] sm:$0xff] }
 0xeca   :  { %v776_v58 = vadd.f32 %v774_v56, %v2872_v15  ;;  %v1037_v56 = vld [vmem:[%s3167_s5] sm:$0xff] }
 0xecc   :  { %2605 = vtanh.f32 %v776_v58  ;;  %v2113_v60 = vmul.f32 -1.442695, %v776_v58 }
 0xece   :  { %2607 = vpow2.f32 %v2113_v60  ;;  %v1039_v60 = vld [vmem:[%s3167_s5 + $0x10] sm:$0xff] }
 0xed6   :  { %v2606_v59 = vpop.eup %2605 }
 0xed7   :  { %789 = vrot.lane.b32.xlu0 %v2606_v59, %s2748_s25  ;;  %v1036_v59 = vld [vmem:[%s3166_s4 + $0x18] sm:$0xff] }
 0xed8   :  { %v2608_v8 = vpop.eup %2607 }
 0xed9   :  { %v780_v61 = vadd.f32 1.0, %v2608_v8  ;;  %v1040_v8 = vld [vmem:[%s3167_s5 + $0x18] sm:$0xff] }
 0xedb   :  { %2609 = vrcp.f32 %v780_v61  ;;  %v2496_v61 = vpack.c.bf16 %v1036_v59, %v1035_v57 }
 0xee5   :  { %v2610_v62 = vpop.eup %2609 }
 0xee6   :  { %v787_v3 = vmul.f32 %v2610_v62, %v785_v12 }
 0xf49   :  { %v790_v63 = vpop.permute.xlu0 %789 }
 0xf4a   :  { %v792_v2 = vmul.f32 %v2610_v62, %v790_v63 }
 0xf4c   :  { %794 = vrot.lane.b32.xlu1 %v792_v2, %s2749_s3 }
 0xfbe   :  { %v795_v4 = vpop.permute.xlu1 %794 }
 0xfbf   :  { %v797_v5 = vadd.f32 %v795_v4, %v787_v3 }
 0xfc1   :  { %2611 = vtanh.f32 %v797_v5  ;;  %v896_v27 = vrot.slane %v797_v5, 6 }
 0xfcb   :  { %v2612_v6 = vpop.eup %2611 }
 0xfcc   :  { %800 = vrot.lane.b32.xlu0 %v2612_v6, %s2748_s25 }
0x103e   :  { %v801_v7 = vpop.permute.xlu0 %800 }
0x103f   :  { %v2950_v9 = vmul.f32 %v2610_v62, %v801_v7  ;;  %v3006_v62 = vpack.c.bf16 %v1040_v8, %v1039_v60 }
0x1041   :  { %v809_v10 = vrot.slane %v2950_v9, 2 }
0x1043   :  { %810 = vrot.lane.b32.xlu1 %v809_v10, %s2749_s3  ;;  %v2118_v10 = vld [vmem:[%s3168_s6] ss:$0 sm:$0xff] }
0x10b5   :  { %v811_v13 = vpop.permute.xlu1 %810 }
0x10b6   :  { %2317 = vmatmul.mubr.msk.f32.vlgmr.msra.gmra.mrb[6].mxu1 %vm155_vm3, %v811_v13 }
0x1189   :  { %v880_v14 = vpop.f32.mrb[6].mxu1 }
0x118a   :  { %v885_v16 = vrot.slane %v880_v14, 4  ;;  %v2318_v18 = vpop.f32.mrb[7].mxu1 }
0x118c   :  { %v887_v19 = vadd.f32 %v885_v16, %v2872_v15 }
0x118e   :  { %2613 = vtanh.f32 %v887_v19  ;;  %v2115_v21 = vmul.f32 -1.442695, %v887_v19 }
0x1190   :  { %2615 = vpow2.f32 %v2115_v21 }
0x1198   :  { %v2614_v20 = vpop.eup %2613 }
0x1199   :  { %900 = vrot.lane.b32.xlu0 %v2614_v20, %s2748_s25 }
0x119a   :  { %v2616_v22 = vpop.eup %2615 }
0x119b   :  { %v891_v23 = vadd.f32 1.0, %v2616_v22 }
0x119d   :  { %2617 = vrcp.f32 %v891_v23 }
0x11a7   :  { %v2618_v24 = vpop.eup %2617 }
0x11a8   :  { %v898_v28 = vmul.f32 %v2618_v24, %v896_v27 }
0x120b   :  { %v901_v25 = vpop.permute.xlu0 %900 }
0x120c   :  { %v903_v26 = vmul.f32 %v2618_v24, %v901_v25 }
0x120e   :  { %905 = vrot.lane.b32.xlu1 %v903_v26, %s2749_s3 }
0x1280   :  { %v906_v29 = vpop.permute.xlu1 %905 }
0x1281   :  { %v908_v30 = vadd.f32 %v906_v29, %v898_v28 }
0x1283   :  { %2619 = vtanh.f32 %v908_v30 }
0x128d   :  { %v2620_v31 = vpop.eup %2619 }
0x128e   :  { %911 = vrot.lane.b32.xlu0 %v2620_v31, %s2748_s25 }
0x1300   :  { %v912_v17 = vpop.permute.xlu0 %911 }
0x1301   :  { %v914_v32 = vmul.f32 %v2618_v24, %v912_v17 }
0x1303   :  { %v920_v34 = vrot.slane %v914_v32, 4 }
0x1305   :  { %921 = vrot.lane.b32.xlu1 %v920_v34, %s2749_s3 }
0x1377   :  { %v922_v35 = vpop.permute.xlu1 %921 }
0x1378   :  { %2328 = vmatmul.mubr.msk.f32.vlgmr.msra.gmra.mrb[8].mxu0 %vm155_vm3, %v922_v35 }
0x1379   :  { %2349 = vmatprep.mubr.msk.f32.mxu0 %vm2746_vm0, %v2747_v1 }
0x144b   :  { %v991_v36 = vpop.f32.mrb[8].mxu0 }
0x144c   :  { %v996_v37 = vrot.slane %v991_v36, 2  ;;  %v2329_v38 = vpop.f32.mrb[9].mxu0 }
0x144e   :  { %v998_v39 = vadd.f32 %v996_v37, %v2872_v15  ;;  %v1007_v15 = vrot.slane %v908_v30, 6 }
0x1450   :  { %2621 = vtanh.f32 %v998_v39  ;;  %v2117_v41 = vmul.f32 -1.442695, %v998_v39 }
0x1452   :  { %2623 = vpow2.f32 %v2117_v41 }
0x145a   :  { %v2622_v40 = vpop.eup %2621 }
0x145b   :  { %1011 = vrot.lane.b32.xlu0 %v2622_v40, %s2748_s25 }
0x145c   :  { %v2624_v42 = vpop.eup %2623 }
0x145d   :  { %v1002_v43 = vadd.f32 1.0, %v2624_v42 }
0x145f   :  { %2625 = vrcp.f32 %v1002_v43 }
0x1469   :  { %v2626_v44 = vpop.eup %2625 }
0x146a   :  { %v1009_v47 = vmul.f32 %v2626_v44, %v1007_v15 }
0x14cd   :  { %v1012_v45 = vpop.permute.xlu0 %1011 }
0x14ce   :  { %v1014_v46 = vmul.f32 %v2626_v44, %v1012_v45 }
0x14d0   :  { %1016 = vrot.lane.b32.xlu1 %v1014_v46, %s2749_s3 }
0x14d4   :  { %364 = vrot.lane.b32.xlu1 %v2893_v52, %s2749_s3 }
0x14d8   :  { %588 = vrot.lane.b32.xlu1 %v2923_v33, %s2749_s3  ;;  %v1033_v33 = vld [vmem:[%s3166_s4] sm:$0xff] }
0x14d9   :  { %v2492_v55 = vpack.c.bf16 %v1034_v54, %v1033_v33 }
0x14db   :  { %2493 = vmatprep.subr.bf16.mxu1 %v2492_v55 }
0x14dc   :  { %916 = vrot.lane.b32.xlu1 %v914_v32, %s2749_s3  ;;  %2495 = vmatpush3.bf16.msra.mxu1 %v2492_v55 }
0x14dd   :  { %2497 = vmatprep.subr.bf16.mxu1 %v2496_v61 }
0x14e0   :  { %2499 = vmatpush3.bf16.msra.mxu1 %v2496_v61 }
0x14e1   :  { %2506 = vmatprep.subr.bf16.mxu1 %v2745_v0 }
0x1542   :  { %v1017_v48 = vpop.permute.xlu1 %1016 }
0x1543   :  { %v1019_v49 = vadd.f32 %v1017_v48, %v1009_v47 }
0x1545   :  { %2627 = vtanh.f32 %v1019_v49 }
0x1546   :  { %v365_v50 = vpop.permute.xlu1 %364 }
0x1547   :  { %368 = vst.msk [vmem:[#allocation2] sm:$0xc] %vm367_vm4, %v365_v50 }
0x154a   :  { %v589_v51 = vpop.permute.xlu1 %588 }
0x154b   :  { %592 = vst.msk [vmem:[#allocation2] sm:$0xc0] %vm591_vm5, %v589_v51 }
0x154e   :  { %v917_v52 = vpop.permute.xlu1 %916 }
0x154f   :  { %v2628_v53 = vpop.eup %2627  ;;  %919 = vst.msk [vmem:[#allocation2 + $0x8] sm:$0x30] %vm479_vm6, %v917_v52 }
0x1550   :  { %1022 = vrot.lane.b32.xlu0 %v2628_v53, %s2748_s25 }
0x1554   :  { %476 = vrot.lane.b32.xlu0 %v2908_v11, %s2749_s3  ;;  %v1038_v11 = vld [vmem:[%s3167_s5 + $0x8] sm:$0xff] }
0x1555   :  { %v2994_v58 = vpack.c.bf16 %v1038_v11, %v1037_v56 }
0x1557   :  { %2502 = vmatpush3.bf16.msra.mxu0 %v2994_v58 }
0x1558   :  { %805 = vrot.lane.b32.xlu0 %v2950_v9, %s2749_s3  ;;  %2503 = vmatprep.subr.bf16.mxu0 %v2745_v0 }
0x155b   :  { %2505 = vmatpush3.bf16.msra.mxu0 %v3006_v62 }
0x155c   :  { %2512 = vmatprep.subr.bf16.mxu0 %v2745_v0 }
0x155e   :  { %2350 = vmatmul.mubr.f32.vlgmr.msra.gmra.mrb[10].mxu0 %v2747_v1 }
0x155f   :  { %2514 = vmatpush3.bf16.msra.mxu0 %v2994_v58  ;;  %2371 = vmatprep.mubr.msk.f32.mxu0 %vm2746_vm0, %v2747_v1 }
0x1560   :  { %2515 = vmatprep.subr.bf16.mxu0 %v2745_v0 }
0x1563   :  { %2517 = vmatpush3.bf16.msra.mxu0 %v3006_v62 }
0x1564   :  { %2524 = vmatprep.subr.bf16.mxu0 %v2745_v0 }
0x15c2   :  { %v1023_v63 = vpop.permute.xlu0 %1022 }
0x15c3   :  { %v1025_v2 = vmul.f32 %v2626_v44, %v1023_v63 }
0x15c5   :  { %1027 = vrot.lane.b32.xlu0 %v1025_v2, %s2749_s3 }
0x15c6   :  { %v477_v12 = vpop.permute.xlu0 %476 }
0x15c7   :  { %480 = vst.msk [vmem:[#allocation2] sm:$0x30] %vm479_vm6, %v477_v12 }
0x15ca   :  { %v806_v3 = vpop.permute.xlu0 %805 }
0x15cb   :  { %808 = vst.msk [vmem:[#allocation2 + $0x8] sm:$0xc] %vm367_vm4, %v806_v3 }
0x15ce   :  { %v1031_v4 = vld [vmem:[#allocation2] sm:$0xff] }
0x15cf   :  { %2338 = vmatprep.mubr.msk.f32.mxu1 %vm155_vm3, %v1031_v4 }
0x1631   :  { %v1195_v7 = vpop.f32.mrb[10].mxu0 }
0x1632   :  { %v2351_v9 = vpop.f32.mrb[11].mxu0 }
0x1637   :  { %v1028_v5 = vpop.permute.xlu0 %1027 }
0x1638   :  { %1030 = vst.msk [vmem:[#allocation2 + $0x8] sm:$0xc0] %vm591_vm5, %v1028_v5 }
0x163f   :  { %v1032_v6 = vld [vmem:[#allocation2 + $0x8] sm:$0xff] }
0x1640   :  { %2339 = vmatmul.mubr.msk.f32.vlgmr.msra.gmra.mrb[8].mxu1 %vm155_vm3, %v1032_v6 }
0x1641   :  { %2508 = vmatpush3.bf16.msra.mxu1 %v2994_v58  ;;  %2360 = vmatprep.mubr.msk.f32.mxu1 %vm2746_vm0, %v2747_v1 }
0x1642   :  { %2509 = vmatprep.subr.bf16.mxu1 %v2745_v0 }
0x1645   :  { %2511 = vmatpush3.bf16.msra.mxu1 %v3006_v62 }
0x1646   :  { %2518 = vmatprep.subr.bf16.mxu1 %v2745_v0 }
0x1713   :  { %v2340_v13 = vpop.f32.mrb[8].mxu1 }
0x1714   :  { %v3034_v14 = vadd.f32 %v2340_v13, %v2118_v10  ;;  %v1120_v16 = vpop.f32.mrb[9].mxu1 }
0x1715   :  { %v3036_v18 = vadd.f32 %v2118_v10, %v1120_v16 }
0x1717   :  { %v1199_v19 = vadd.f32 %v1195_v7, %v3036_v18 }
0x1719   :  { %2629 = vtanh.f32 %v1199_v19  ;;  %v2121_v21 = vmul.f32 -1.442695, %v1199_v19 }
0x171b   :  { %2631 = vpow2.f32 %v2121_v21 }
0x1723   :  { %v2630_v20 = vpop.eup %2629 }
0x1724   :  { %1209 = vrot.lane.b32.xlu1 %v2630_v20, %s2748_s25 }
0x1725   :  { %v2632_v22 = vpop.eup %2631 }
0x1726   :  { %v1203_v23 = vadd.f32 1.0, %v2632_v22 }
0x1728   :  { %2633 = vrcp.f32 %v1203_v23 }
0x1732   :  { %v2634_v24 = vpop.eup %2633 }
0x1733   :  { %v1207_v27 = vmul.f32 0.0, %v2634_v24 }
0x1796   :  { %v1210_v25 = vpop.permute.xlu1 %1209 }
0x1797   :  { %v1212_v26 = vmul.f32 %v2634_v24, %v1210_v25 }
0x1799   :  { %1214 = vrot.lane.b32.xlu0 %v1212_v26, %s2749_s3 }
0x180b   :  { %v1215_v28 = vpop.permute.xlu0 %1214 }
0x180c   :  { %v1217_v29 = vadd.f32 %v1215_v28, %v1207_v27 }
0x180e   :  { %2635 = vtanh.f32 %v1217_v29  ;;  %v1313_v45 = vrot.slane %v1217_v29, 6 }
0x1818   :  { %v2636_v30 = vpop.eup %2635 }
0x1819   :  { %1220 = vrot.lane.b32.xlu1 %v2636_v30, %s2748_s25 }
0x188b   :  { %v1221_v31 = vpop.permute.xlu1 %1220 }
0x188c   :  { %v1223_v17 = vmul.f32 %v2634_v24, %v1221_v31 }
0x188e   :  { %1225 = vrot.lane.b32.xlu0 %v1223_v17, %s2749_s3 }
0x1900   :  { %v1226_v32 = vpop.permute.xlu0 %1225 }
0x1901   :  { %1228 = vst.msk [vmem:[#allocation3] sm:$0x3] %vm258_vm2, %v1226_v32  ;;  %2361 = vmatmul.mubr.msk.f32.vlgmr.msra.gmra.mrb[10].mxu1 %vm155_vm3, %v1226_v32 }
0x1902   :  { %2520 = vmatpush3.bf16.msra.mxu1 %v2994_v58  ;;  %2382 = vmatprep.mubr.msk.f32.mxu1 %vm2746_vm0, %v2747_v1 }
0x1903   :  { %2521 = vmatprep.subr.bf16.mxu1 %v2745_v0 }
0x1906   :  { %2523 = vmatpush3.bf16.msra.mxu1 %v3006_v62 }
0x1907   :  { %2530 = vmatprep.subr.bf16.mxu1 %v2745_v0 }
0x19d4   :  { %v1297_v34 = vpop.f32.mrb[10].mxu1 }
0x19d5   :  { %v1302_v35 = vrot.slane %v1297_v34, 6  ;;  %v2362_v36 = vpop.f32.mrb[11].mxu1 }
0x19d7   :  { %v1304_v37 = vadd.f32 %v1302_v35, %v3036_v18 }
0x19d9   :  { %2637 = vtanh.f32 %v1304_v37  ;;  %v2123_v39 = vmul.f32 -1.442695, %v1304_v37 }
0x19db   :  { %2639 = vpow2.f32 %v2123_v39 }
0x19e3   :  { %v2638_v38 = vpop.eup %2637 }
0x19e4   :  { %1317 = vrot.lane.b32.xlu1 %v2638_v38, %s2748_s25 }
0x19e5   :  { %v2640_v40 = vpop.eup %2639 }
0x19e6   :  { %v1308_v41 = vadd.f32 1.0, %v2640_v40 }
0x19e8   :  { %2641 = vrcp.f32 %v1308_v41 }
0x19f2   :  { %v2642_v42 = vpop.eup %2641 }
0x19f3   :  { %v1315_v46 = vmul.f32 %v2642_v42, %v1313_v45 }
0x1a56   :  { %v1318_v43 = vpop.permute.xlu1 %1317 }
0x1a57   :  { %v1320_v44 = vmul.f32 %v2642_v42, %v1318_v43 }
0x1a59   :  { %1322 = vrot.lane.b32.xlu0 %v1320_v44, %s2749_s3 }
0x1acb   :  { %v1323_v15 = vpop.permute.xlu0 %1322 }
0x1acc   :  { %v1325_v47 = vadd.f32 %v1323_v15, %v1315_v46 }
0x1ace   :  { %2643 = vtanh.f32 %v1325_v47  ;;  %v1424_v63 = vrot.slane %v1325_v47, 6 }
0x1ad8   :  { %v2644_v48 = vpop.eup %2643 }
0x1ad9   :  { %1328 = vrot.lane.b32.xlu1 %v2644_v48, %s2748_s25 }
0x1b4b   :  { %v1329_v49 = vpop.permute.xlu1 %1328 }
0x1b4c   :  { %v3055_v50 = vmul.f32 %v2642_v42, %v1329_v49 }
0x1b4e   :  { %v1337_v51 = vrot.slane %v3055_v50, 2 }
0x1b50   :  { %1338 = vrot.lane.b32.xlu0 %v1337_v51, %s2749_s3 }
0x1bc2   :  { %v1339_v52 = vpop.permute.xlu0 %1338 }
0x1bc3   :  { %2372 = vmatmul.mubr.msk.f32.vlgmr.msra.gmra.mrb[12].mxu0 %vm155_vm3, %v1339_v52 }
0x1bc4   :  { %2526 = vmatpush3.bf16.msra.mxu0 %v2994_v58  ;;  %2393 = vmatprep.mubr.msk.f32.mxu0 %vm2746_vm0, %v2747_v1 }
0x1bc5   :  { %2527 = vmatprep.subr.bf16.mxu0 %v2745_v0 }
0x1bc8   :  { %2529 = vmatpush3.bf16.msra.mxu0 %v3006_v62 }
0x1bc9   :  { %2536 = vmatprep.subr.bf16.mxu0 %v2745_v0 }
0x1c96   :  { %v1408_v53 = vpop.f32.mrb[12].mxu0 }
0x1c97   :  { %v1413_v33 = vrot.slane %v1408_v53, 4  ;;  %v2373_v54 = vpop.f32.mrb[13].mxu0 }
0x1c99   :  { %v1415_v55 = vadd.f32 %v1413_v33, %v3036_v18 }
0x1c9b   :  { %2645 = vtanh.f32 %v1415_v55  ;;  %v2125_v11 = vmul.f32 -1.442695, %v1415_v55 }
0x1c9d   :  { %2647 = vpow2.f32 %v2125_v11 }
0x1ca5   :  { %v2646_v56 = vpop.eup %2645 }
0x1ca6   :  { %1428 = vrot.lane.b32.xlu1 %v2646_v56, %s2748_s25 }
0x1ca7   :  { %v2648_v57 = vpop.eup %2647 }
0x1ca8   :  { %v1419_v59 = vadd.f32 1.0, %v2648_v57 }
0x1caa   :  { %2649 = vrcp.f32 %v1419_v59 }
0x1cb4   :  { %v2650_v60 = vpop.eup %2649 }
0x1cb5   :  { %v1426_v2 = vmul.f32 %v2650_v60, %v1424_v63 }
0x1d18   :  { %v1429_v8 = vpop.permute.xlu1 %1428 }
0x1d19   :  { %v1431_v61 = vmul.f32 %v2650_v60, %v1429_v8 }
0x1d1b   :  { %1433 = vrot.lane.b32.xlu0 %v1431_v61, %s2749_s3 }
0x1d8d   :  { %v1434_v12 = vpop.permute.xlu0 %1433 }
0x1d8e   :  { %v1436_v3 = vadd.f32 %v1434_v12, %v1426_v2 }
0x1d90   :  { %2651 = vtanh.f32 %v1436_v3  ;;  %v1535_v27 = vrot.slane %v1436_v3, 6 }
0x1d9a   :  { %v2652_v4 = vpop.eup %2651 }
0x1d9b   :  { %1439 = vrot.lane.b32.xlu1 %v2652_v4, %s2748_s25 }
0x1e0d   :  { %v1440_v5 = vpop.permute.xlu1 %1439 }
0x1e0e   :  { %v3070_v6 = vmul.f32 %v2650_v60, %v1440_v5 }
0x1e10   :  { %v1448_v7 = vrot.slane %v3070_v6, 4 }
0x1e12   :  { %1449 = vrot.lane.b32.xlu0 %v1448_v7, %s2749_s3 }
0x1e84   :  { %v1450_v9 = vpop.permute.xlu0 %1449 }
0x1e85   :  { %2383 = vmatmul.mubr.msk.f32.vlgmr.msra.gmra.mrb[12].mxu1 %vm155_vm3, %v1450_v9 }
0x1e86   :  { %2532 = vmatpush3.bf16.msra.mxu1 %v2994_v58  ;;  %2404 = vmatprep.mubr.msk.f32.mxu1 %vm2746_vm0, %v2747_v1 }
0x1e87   :  { %2533 = vmatprep.subr.bf16.mxu1 %v2745_v0 }
0x1e8a   :  { %2535 = vmatpush3.bf16.msra.mxu1 %v3006_v62 }
0x1e8b   :  { %2542 = vmatprep.subr.bf16.mxu1 %v2745_v0 }
0x1f58   :  { %v1519_v10 = vpop.f32.mrb[12].mxu1 }
0x1f59   :  { %v1524_v13 = vrot.slane %v1519_v10, 2  ;;  %v2384_v16 = vpop.f32.mrb[13].mxu1 }
0x1f5b   :  { %v1526_v19 = vadd.f32 %v1524_v13, %v3036_v18 }
0x1f5d   :  { %2653 = vtanh.f32 %v1526_v19  ;;  %v2127_v21 = vmul.f32 -1.442695, %v1526_v19 }
0x1f5f   :  { %2655 = vpow2.f32 %v2127_v21 }
0x1f67   :  { %v2654_v20 = vpop.eup %2653 }
0x1f68   :  { %1539 = vrot.lane.b32.xlu1 %v2654_v20, %s2748_s25 }
0x1f69   :  { %v2656_v22 = vpop.eup %2655 }
0x1f6a   :  { %v1530_v23 = vadd.f32 1.0, %v2656_v22 }
0x1f6c   :  { %2657 = vrcp.f32 %v1530_v23 }
0x1f76   :  { %v2658_v24 = vpop.eup %2657 }
0x1f77   :  { %v1537_v28 = vmul.f32 %v2658_v24, %v1535_v27 }
0x1fda   :  { %v1540_v25 = vpop.permute.xlu1 %1539 }
0x1fdb   :  { %v1542_v26 = vmul.f32 %v2658_v24, %v1540_v25 }
0x1fdd   :  { %1544 = vrot.lane.b32.xlu0 %v1542_v26, %s2749_s3 }
0x204f   :  { %v1545_v29 = vpop.permute.xlu0 %1544 }
0x2050   :  { %v1547_v30 = vadd.f32 %v1545_v29, %v1537_v28 }
0x2052   :  { %2659 = vtanh.f32 %v1547_v30  ;;  %v1643_v45 = vrot.slane %v1547_v30, 6 }
0x205c   :  { %v2660_v18 = vpop.eup %2659 }
0x205d   :  { %1550 = vrot.lane.b32.xlu1 %v2660_v18, %s2748_s25 }
0x20cf   :  { %v1551_v31 = vpop.permute.xlu1 %1550 }
0x20d0   :  { %v3085_v17 = vmul.f32 %v2658_v24, %v1551_v31 }
0x20d2   :  { %v1559_v32 = vrot.slane %v3085_v17, 6 }
0x20d4   :  { %1560 = vrot.lane.b32.xlu0 %v1559_v32, %s2749_s3 }
0x2146   :  { %v1561_v34 = vpop.permute.xlu0 %1560 }
0x2147   :  { %2394 = vmatmul.mubr.msk.f32.vlgmr.msra.gmra.mrb[14].mxu0 %vm155_vm3, %v1561_v34 }
0x2148   :  { %2538 = vmatpush3.bf16.msra.mxu0 %v2994_v58  ;;  %2415 = vmatprep.mubr.msk.f32.mxu0 %vm2746_vm0, %v2747_v1 }
0x2149   :  { %2539 = vmatprep.subr.bf16.mxu0 %v2745_v0 }
0x214c   :  { %2541 = vmatpush3.bf16.msra.mxu0 %v3006_v62 }
0x221a   :  { %v1630_v35 = vpop.f32.mrb[14].mxu0 }
0x221b   :  { %v1634_v36 = vadd.f32 %v1630_v35, %v3034_v14  ;;  %v2395_v37 = vpop.f32.mrb[15].mxu0 }
0x221d   :  { %2661 = vtanh.f32 %v1634_v36  ;;  %v2129_v39 = vmul.f32 -1.442695, %v1634_v36 }
0x221f   :  { %2663 = vpow2.f32 %v2129_v39 }
0x2227   :  { %v2662_v38 = vpop.eup %2661 }
0x2228   :  { %1647 = vrot.lane.b32.xlu1 %v2662_v38, %s2748_s25 }
0x2229   :  { %v2664_v40 = vpop.eup %2663 }
0x222a   :  { %v1638_v41 = vadd.f32 1.0, %v2664_v40 }
0x222c   :  { %2665 = vrcp.f32 %v1638_v41 }
0x2236   :  { %v2666_v42 = vpop.eup %2665 }
0x2237   :  { %v1645_v46 = vmul.f32 %v2666_v42, %v1643_v45 }
0x229a   :  { %v1648_v43 = vpop.permute.xlu1 %1647 }
0x229b   :  { %v1650_v44 = vmul.f32 %v2666_v42, %v1648_v43 }
0x229d   :  { %1652 = vrot.lane.b32.xlu0 %v1650_v44, %s2749_s3 }
0x230f   :  { %v1653_v15 = vpop.permute.xlu0 %1652 }
0x2310   :  { %v1655_v47 = vadd.f32 %v1653_v15, %v1645_v46 }
0x2312   :  { %2667 = vtanh.f32 %v1655_v47 }
0x231c   :  { %v2668_v48 = vpop.eup %2667 }
0x231d   :  { %1658 = vrot.lane.b32.xlu1 %v2668_v48, %s2748_s25 }
0x238f   :  { %v1659_v49 = vpop.permute.xlu1 %1658 }
0x2390   :  { %v1661_v51 = vmul.f32 %v2666_v42, %v1659_v49 }
0x2392   :  { %1663 = vrot.lane.b32.xlu0 %v1661_v51, %s2749_s3 }
0x2404   :  { %v1664_v52 = vpop.permute.xlu0 %1663 }
0x2405   :  { %1666 = vst.msk [vmem:[#allocation3 + $0x8] sm:$0x3] %vm258_vm2, %v1664_v52  ;;  %2405 = vmatmul.mubr.msk.f32.vlgmr.msra.gmra.mrb[14].mxu1 %vm155_vm3, %v1664_v52  ;;  %v2001_v52 = vld [vmem:[%s3169_s7 + $0x10] sm:$0xff] }
0x2406   :  { %2544 = vmatpush3.bf16.msra.mxu1 %v2994_v58  ;;  %2426 = vmatprep.mubr.msk.f32.mxu1 %vm2746_vm0, %v2747_v1 }
0x2407   :  { %2545 = vmatprep.subr.bf16.mxu1 %v2745_v0  ;;  %v1751_v0 = vrot.slane %v1655_v47, 6 }
0x240a   :  { %2547 = vmatpush3.bf16.msra.mxu1 %v3006_v62 }
0x24d8   :  { %v1735_v53 = vpop.f32.mrb[14].mxu1 }
0x24d9   :  { %v1740_v33 = vrot.slane %v1735_v53, 6  ;;  %v2406_v54 = vpop.f32.mrb[15].mxu1 }
0x24db   :  { %v1742_v55 = vadd.f32 %v1740_v33, %v3034_v14 }
0x24dd   :  { %2669 = vtanh.f32 %v1742_v55  ;;  %v2131_v11 = vmul.f32 -1.442695, %v1742_v55 }
0x24df   :  { %2671 = vpow2.f32 %v2131_v11 }
0x24e7   :  { %v2670_v56 = vpop.eup %2669 }
0x24e8   :  { %1755 = vrot.lane.b32.xlu1 %v2670_v56, %s2748_s25 }
0x24e9   :  { %v2672_v57 = vpop.eup %2671 }
0x24ea   :  { %v1746_v58 = vadd.f32 1.0, %v2672_v57 }
0x24ec   :  { %2673 = vrcp.f32 %v1746_v58 }
0x24f6   :  { %v2674_v59 = vpop.eup %2673 }
0x24f7   :  { %v1753_v62 = vmul.f32 %v2674_v59, %v1751_v0 }
0x255a   :  { %v1756_v1 = vpop.permute.xlu1 %1755 }
0x255b   :  { %v1758_v60 = vmul.f32 %v2674_v59, %v1756_v1 }
0x255d   :  { %1760 = vrot.lane.b32.xlu0 %v1758_v60, %s2749_s3 }
0x25cf   :  { %v1761_v8 = vpop.permute.xlu0 %1760 }
0x25d0   :  { %v1763_v61 = vadd.f32 %v1761_v8, %v1753_v62 }
0x25d2   :  { %2675 = vtanh.f32 %v1763_v61  ;;  %v1862_v24 = vrot.slane %v1763_v61, 6 }
0x25dc   :  { %v2676_v63 = vpop.eup %2675 }
0x25dd   :  { %1766 = vrot.lane.b32.xlu1 %v2676_v63, %s2748_s25 }
0x264f   :  { %v1767_v2 = vpop.permute.xlu1 %1766 }
0x2650   :  { %v3111_v12 = vmul.f32 %v2674_v59, %v1767_v2  ;;  %v2136_v59 = vld [vmem:[#allocation6] ss:$0 sm:$0xff] }
0x2652   :  { %v1775_v3 = vrot.slane %v3111_v12, 2 }
0x2654   :  { %1776 = vrot.lane.b32.xlu0 %v1775_v3, %s2749_s3 }
0x26c6   :  { %v1777_v4 = vpop.permute.xlu0 %1776 }
0x26c7   :  { %2416 = vmatmul.mubr.msk.f32.vlgmr.msra.gmra.mrb[16].mxu0 %vm155_vm3, %v1777_v4 }
0x279a   :  { %v1846_v5 = vpop.f32.mrb[16].mxu0 }
0x279b   :  { %v1851_v7 = vrot.slane %v1846_v5, 4  ;;  %v2417_v9 = vpop.f32.mrb[17].mxu0 }
0x279d   :  { %v1853_v10 = vadd.f32 %v1851_v7, %v3034_v14 }
0x279f   :  { %2677 = vtanh.f32 %v1853_v10  ;;  %v2133_v16 = vmul.f32 -1.442695, %v1853_v10 }
0x27a1   :  { %2679 = vpow2.f32 %v2133_v16 }
0x27a9   :  { %v2678_v13 = vpop.eup %2677 }
0x27aa   :  { %1866 = vrot.lane.b32.xlu1 %v2678_v13, %s2748_s25 }
0x27ab   :  { %v2680_v19 = vpop.eup %2679 }
0x27ac   :  { %v1857_v20 = vadd.f32 1.0, %v2680_v19 }
0x27ae   :  { %2681 = vrcp.f32 %v1857_v20 }
0x27b8   :  { %v2682_v21 = vpop.eup %2681 }
0x27b9   :  { %v1864_v25 = vmul.f32 %v2682_v21, %v1862_v24 }
0x281c   :  { %v1867_v22 = vpop.permute.xlu1 %1866 }
0x281d   :  { %v1869_v23 = vmul.f32 %v2682_v21, %v1867_v22 }
0x281f   :  { %1871 = vrot.lane.b32.xlu0 %v1869_v23, %s2749_s3 }
0x2891   :  { %v1872_v26 = vpop.permute.xlu0 %1871 }
0x2892   :  { %v1874_v27 = vadd.f32 %v1872_v26, %v1864_v25 }
0x2894   :  { %2683 = vtanh.f32 %v1874_v27 }
0x289e   :  { %v2684_v28 = vpop.eup %2683 }
0x289f   :  { %1877 = vrot.lane.b32.xlu1 %v2684_v28, %s2748_s25 }
0x2911   :  { %v1878_v29 = vpop.permute.xlu1 %1877 }
0x2912   :  { %v1880_v30 = vmul.f32 %v2682_v21, %v1878_v29 }
0x2914   :  { %v1886_v18 = vrot.slane %v1880_v30, 4 }
0x2916   :  { %1887 = vrot.lane.b32.xlu0 %v1886_v18, %s2749_s3 }
0x2988   :  { %v1888_v31 = vpop.permute.xlu0 %1887 }
0x2989   :  { %2427 = vmatmul.mubr.msk.f32.vlgmr.msra.gmra.mrb[16].mxu1 %vm155_vm3, %v1888_v31 }
0x2a5c   :  { %v1957_v32 = vpop.f32.mrb[16].mxu1 }
0x2a5d   :  { %v1962_v34 = vrot.slane %v1957_v32, 2  ;;  %v2428_v35 = vpop.f32.mrb[17].mxu1 }
0x2a5f   :  { %v1964_v36 = vadd.f32 %v1962_v34, %v3034_v14  ;;  %v1973_v14 = vrot.slane %v1874_v27, 6 }
0x2a61   :  { %2685 = vtanh.f32 %v1964_v36  ;;  %v2135_v38 = vmul.f32 -1.442695, %v1964_v36 }
0x2a63   :  { %2687 = vpow2.f32 %v2135_v38 }
0x2a6b   :  { %v2686_v37 = vpop.eup %2685 }
0x2a6c   :  { %1977 = vrot.lane.b32.xlu1 %v2686_v37, %s2748_s25 }
0x2a6d   :  { %v2688_v39 = vpop.eup %2687 }
0x2a6e   :  { %v1968_v40 = vadd.f32 1.0, %v2688_v39 }
0x2a70   :  { %2689 = vrcp.f32 %v1968_v40 }
0x2a7a   :  { %v2690_v41 = vpop.eup %2689 }
0x2a7b   :  { %v1975_v44 = vmul.f32 %v2690_v41, %v1973_v14 }
0x2ade   :  { %v1978_v42 = vpop.permute.xlu1 %1977 }
0x2adf   :  { %v1980_v43 = vmul.f32 %v2690_v41, %v1978_v42 }
0x2ae1   :  { %1982 = vrot.lane.b32.xlu0 %v1980_v43, %s2749_s3 }
0x2ae5   :  { %1333 = vrot.lane.b32.xlu0 %v3055_v50, %s2749_s3  ;;  %v1999_v50 = vld [vmem:[%s3169_s7] sm:$0xff] }
0x2ae9   :  { %1555 = vrot.lane.b32.xlu0 %v3085_v17, %s2749_s3  ;;  %v2000_v17 = vld [vmem:[%s3169_s7 + $0x8] sm:$0xff] }
0x2aea   :  { %v2548_v51 = vpack.c.bf16 %v2000_v17, %v1999_v50 }
0x2aec   :  { %2549 = vmatprep.subr.bf16.mxu0 %v2548_v51 }
0x2aed   :  { %1882 = vrot.lane.b32.xlu0 %v1880_v30, %s2749_s3  ;;  %2551 = vmatpush3.bf16.msra.mxu0 %v2548_v51 }
0x2b53   :  { %v1983_v45 = vpop.permute.xlu0 %1982 }
0x2b54   :  { %v1985_v46 = vadd.f32 %v1983_v45, %v1975_v44 }
0x2b56   :  { %2691 = vtanh.f32 %v1985_v46 }
0x2b57   :  { %v1334_v15 = vpop.permute.xlu0 %1333 }
0x2b58   :  { %1336 = vst.msk [vmem:[#allocation3] sm:$0xc] %vm367_vm4, %v1334_v15 }
0x2b5b   :  { %v1556_v47 = vpop.permute.xlu0 %1555 }
0x2b5c   :  { %1558 = vst.msk [vmem:[#allocation3] sm:$0xc0] %vm591_vm5, %v1556_v47 }
0x2b5f   :  { %v1883_v48 = vpop.permute.xlu0 %1882 }
0x2b60   :  { %v2692_v49 = vpop.eup %2691  ;;  %1885 = vst.msk [vmem:[#allocation3 + $0x8] sm:$0x30] %vm479_vm6, %v1883_v48 }
0x2b61   :  { %1988 = vrot.lane.b32.xlu1 %v2692_v49, %s2748_s25 }
0x2b65   :  { %1444 = vrot.lane.b32.xlu1 %v3070_v6, %s2749_s3  ;;  %v2002_v6 = vld [vmem:[%s3169_s7 + $0x18] sm:$0xff] }
0x2b66   :  { %v2552_v53 = vpack.c.bf16 %v2002_v6, %v2001_v52 }
0x2b68   :  { %2553 = vmatprep.subr.bf16.mxu0 %v2552_v53 }
0x2b69   :  { %1771 = vrot.lane.b32.xlu1 %v3111_v12, %s2749_s3  ;;  %2555 = vmatpush3.bf16.msra.mxu0 %v2552_v53 }
0x2bd3   :  { %v1989_v33 = vpop.permute.xlu1 %1988 }
0x2bd4   :  { %v1991_v54 = vmul.f32 %v2690_v41, %v1989_v33 }
0x2bd6   :  { %1993 = vrot.lane.b32.xlu1 %v1991_v54, %s2749_s3 }
0x2bd7   :  { %v1445_v55 = vpop.permute.xlu1 %1444 }
0x2bd8   :  { %1447 = vst.msk [vmem:[#allocation3] sm:$0x30] %vm479_vm6, %v1445_v55 }
0x2bdb   :  { %v1772_v56 = vpop.permute.xlu1 %1771 }
0x2bdc   :  { %1774 = vst.msk [vmem:[#allocation3 + $0x8] sm:$0xc] %vm367_vm4, %v1772_v56 }
0x2bdf   :  { %v1997_v11 = vld [vmem:[#allocation3] sm:$0xff] }
0x2be0   :  { %2437 = vmatprep.mubr.msk.f32.mxu0 %vm155_vm3, %v1997_v11 }
0x2c48   :  { %v1994_v57 = vpop.permute.xlu1 %1993 }
0x2c49   :  { %1996 = vst.msk [vmem:[#allocation3 + $0x8] sm:$0xc0] %vm591_vm5, %v1994_v57 }
0x2c50   :  { %v1998_v58 = vld [vmem:[#allocation3 + $0x8] sm:$0xff] }
0x2c51   :  { %2438 = vmatmul.mubr.msk.f32.vlgmr.msra.gmra.mrb[18].mxu0 %vm155_vm3, %v1998_v58 }
0x2d24   :  { %v2439_v1 = vpop.f32.mrb[18].mxu0 }
0x2d25   :  { %v2088_v60 = vadd.f32 %v2439_v1, %v2136_v59  ;;  %v2082_v0 = vpop.f32.mrb[19].mxu0 }
0x2d26   :  { %v2083_v62 = vadd.f32 %v2136_v59, %v2082_v0 }
0x2d27   :  { %2093 = vst.msk [vmem:[%s3171_s9 + $0x8] sm:$0xff] %vm2091_vm7, %v2088_v60 }
0x2d28   :  { %2092 = vst.msk [vmem:[%s3171_s9] sm:$0xff] %vm2091_vm7, %v2083_v62 }
0x2d29   :  { %2098 = vsyncpa [#allocation5], 1 }
0x2d2a   :  { %2099 = vsyncpa [#allocation7], 1 }

</bundles_post_ra>
